<compile_context>
chip_gen: v7x
topology: tpu7x:2x2x1
jax: 0.10.0
libtpu: 0.0.40
codegen_flags: <defaults>
</compile_context>

<pallas_src>
import functools

import jax
import jax.numpy as jnp
from jax.experimental import pallas as pl
from jax.experimental.pallas import tpu as pltpu

BN_EPS = 1e-5
OUT_LANES = 128          # lane-dense output slab width
NUM_WEIGHTS = 12         # weight matrices in the packed slab (rest are vectors)


def _round_up(x, m):
    return (x + m - 1) // m * m


# ----------------------------------------------------------------------------
# In-kernel helper (operates on loaded f32 values)
# ----------------------------------------------------------------------------
def _bn_relu(h, gamma, beta, relu=True):
    # Training-mode BatchNorm1d, one reduction pass, all f32:
    #   mean = E[h], var = E[h^2] - mean^2 (biased), folded scale/shift.
    inv_n = 1.0 / h.shape[0]
    mean = jnp.sum(h, axis=0, keepdims=True) * inv_n
    mean_sq = jnp.sum(h * h, axis=0, keepdims=True) * inv_n
    var = jnp.maximum(mean_sq - mean * mean, 0.0)
    scale = gamma * jax.lax.rsqrt(var + BN_EPS)
    h = h * scale + (beta - mean * scale)
    if relu:
        h = jnp.maximum(h, 0.0)
    return h


# ----------------------------------------------------------------------------
# Fused forward kernel: encoders + adjacency build + 3 GIN convs + readouts
# ----------------------------------------------------------------------------
def fused_gin_kernel(task_x_ref, vm_x_ref, edge_sd_ref, edge_dst_ref,
                     slab_ref, out_ref,
                     *, w_layout, v_layout, edge_row_off, graph_row_off):
    f32 = jnp.float32
    bf16 = jnp.bfloat16

    n_nodes = task_x_ref.shape[0] + vm_x_ref.shape[0]
    n_edges = edge_dst_ref.shape[1]

    # --- parameter slab carving (static ref slices: free) --------------------
    def W(i):                                   # bf16 weight for the MXU
        off, r, c = w_layout[i]
        return slab_ref[off:off + r, 0:c].astype(bf16)

    def V(i):                                   # f32 bias / BN vector (1, c)
        off, r, c = v_layout[i]
        return slab_ref[off:off + 1, 0:c]

    def mxu(x, w_bf16):                         # bf16 operands, f32 accumulate
        return jnp.dot(x.astype(bf16), w_bf16, preferred_element_type=f32)

    # --- node encoders: Linear -> BN -> ReLU -> Linear -> BN -> ReLU -> Linear
    def encoder(x, wi, vi):
        h = mxu(x, W(wi)) + V(vi)
        h = _bn_relu(h, V(vi + 1), V(vi + 2))
        h = mxu(h, W(wi + 1)) + V(vi + 3)
        h = _bn_relu(h, V(vi + 4), V(vi + 5))
        return mxu(h, W(wi + 2)) + V(vi + 6)

    task_h = encoder(task_x_ref[...], 0, 0)
    vm_h = encoder(vm_x_ref[...], 3, 7)
    node_x = jnp.concatenate([task_h, vm_h], axis=0)        # (N, E) in-register

    # --- build (A + I) and edge gather one-hots in-kernel ---------------------
    edge_sd = edge_sd_ref[...]                               # (2E, 1) int32: src rows, then dst rows
    node_iota = jax.lax.broadcasted_iota(jnp.int32, (2 * n_edges, n_nodes), 1)
    gather = (edge_sd == node_iota).astype(f32)              # (2E, N) one-hot rows
    src_oh = gather[0:n_edges]                               # (E, N)

    dst_row = edge_dst_ref[...]                              # (1, E) int32
    row_iota = jax.lax.broadcasted_iota(jnp.int32, (n_nodes, n_edges), 0)
    dst_oh_t = (dst_row == row_iota).astype(f32)             # (N, E)

    eye = (jax.lax.broadcasted_iota(jnp.int32, (n_nodes, n_nodes), 0) ==
           jax.lax.broadcasted_iota(jnp.int32, (n_nodes, n_nodes), 1)).astype(f32)
    adj = jnp.dot(dst_oh_t, src_oh, preferred_element_type=f32) + eye  # (N, N)
    adj_bf = adj.astype(bf16)                                # exact: small-int counts

    # --- GIN: h = MLP((A+I) @ x), ReLU between convs ---------------------------
    def gin_conv(x, wi, vi, final_relu):
        agg = jnp.dot(adj_bf, x.astype(bf16), preferred_element_type=f32)
        h = mxu(agg, W(wi)) + V(vi)
        h = _bn_relu(h, V(vi + 1), V(vi + 2))
        h = mxu(h, W(wi + 1)) + V(vi + 3)
        return jnp.maximum(h, 0.0) if final_relu else h

    h = gin_conv(node_x, 6, 14, True)
    h = gin_conv(h, 8, 18, True)
    node_emb = gin_conv(h, 10, 22, False)                    # (N, E) f32

    # --- readouts into one lane-dense output slab ------------------------------
    def pad_lanes(x):
        r, c = x.shape
        if c == OUT_LANES:
            return x
        return jnp.concatenate([x, jnp.zeros((r, OUT_LANES - c), f32)], axis=1)

    out_ref[...] = jnp.zeros_like(out_ref)                   # deterministic padding
    out_ref[0:n_nodes, :] = pad_lanes(node_emb)

    # Edge embeddings: single fused one-hot gather matmul (kept f32 so the
    # gathered values exactly equal node_emb), then lane-concat src|dst halves.
    both = jnp.dot(gather, node_emb, preferred_element_type=f32)       # (2E, E)
    edge_emb = jnp.concatenate([both[0:n_edges], both[n_edges:2 * n_edges]],
                               axis=1)                                  # (E, 2E)
    out_ref[edge_row_off:edge_row_off + n_edges, :] = pad_lanes(edge_emb)

    # global_mean_pool with batch = zeros -> mean over all nodes.
    graph_emb = jnp.mean(node_emb, axis=0, keepdims=True)
    out_ref[graph_row_off:graph_row_off + 1, :] = pad_lanes(graph_emb)


def run_fused_forward(task_x, vm_x, edge_sd, edge_dst, param_slab,
                      *, w_layout, v_layout, num_tasks, num_vms, embedding_dim):
    n_nodes = num_tasks + num_vms
    n_edges = edge_dst.shape[1]
    edge_row_off = _round_up(n_nodes, 8)
    graph_row_off = edge_row_off + _round_up(n_edges, 8)
    total_rows = graph_row_off + 8

    kernel = functools.partial(
        fused_gin_kernel,
        w_layout=w_layout, v_layout=v_layout,
        edge_row_off=edge_row_off, graph_row_off=graph_row_off)

    vmem = pltpu.MemorySpace.VMEM
    out = pl.pallas_call(
        kernel,
        out_shape=jax.ShapeDtypeStruct((total_rows, OUT_LANES), jnp.float32),
        in_specs=[pl.BlockSpec(memory_space=vmem)] * 5,
        out_specs=pl.BlockSpec(memory_space=vmem),
    )(task_x, vm_x, edge_sd, edge_dst, param_slab)

    node_emb = out[0:n_nodes, 0:embedding_dim]
    edge_emb = out[edge_row_off:edge_row_off + n_edges, 0:2 * embedding_dim]
    graph_emb = out[graph_row_off:graph_row_off + 1, 0:embedding_dim]
    return node_emb, edge_emb, graph_emb


# ----------------------------------------------------------------------------
# Deterministic parameter init (PyTorch-style uniform(-1/sqrt(fan_in), +))
# ----------------------------------------------------------------------------
def _linear_params(key, fan_in, fan_out):
    kw, kb = jax.random.split(key)
    bound = 1.0 / (fan_in ** 0.5)
    w = jax.random.uniform(kw, (fan_in, fan_out), jnp.float32, -bound, bound)
    b = jax.random.uniform(kb, (1, fan_out), jnp.float32, -bound, bound)
    return w, b


def _bn_params(dim):
    return jnp.ones((1, dim), jnp.float32), jnp.zeros((1, dim), jnp.float32)


def make_encoder_params(key, in_dim, hidden_dim, emb_dim):
    k1, k2, k3 = jax.random.split(key, 3)
    w1, b1 = _linear_params(k1, in_dim, hidden_dim)
    g1, be1 = _bn_params(hidden_dim)
    w2, b2 = _linear_params(k2, hidden_dim, hidden_dim)
    g2, be2 = _bn_params(hidden_dim)
    w3, b3 = _linear_params(k3, hidden_dim, emb_dim)
    return (w1, b1, g1, be1, w2, b2, g2, be2, w3, b3)


def make_gin_mlp_params(key, in_dim, mid_dim, out_dim):
    k1, k2 = jax.random.split(key)
    w1, b1 = _linear_params(k1, in_dim, mid_dim)
    g, be = _bn_params(mid_dim)
    w2, b2 = _linear_params(k2, mid_dim, out_dim)
    return (w1, b1, g, be, w2, b2)


# ----------------------------------------------------------------------------
# Parameter slab packing (host-side, once): one contiguous f32 slab,
# weight rows 8-aligned, every bias/BN vector on its own 8-aligned row.
# ----------------------------------------------------------------------------
def _flatten_params(params):
    t, v = params["task_encoder"], params["vm_encoder"]
    g1, g2, g3 = params["gin1"], params["gin2"], params["gin3"]
    weights = [t[0], t[4], t[8], v[0], v[4], v[8],
               g1[0], g1[4], g2[0], g2[4], g3[0], g3[4]]
    vectors = [t[1], t[2], t[3], t[5], t[6], t[7], t[9],
               v[1], v[2], v[3], v[5], v[6], v[7], v[9],
               g1[1], g1[2], g1[3], g1[5],
               g2[1], g2[2], g2[3], g2[5],
               g3[1], g3[2], g3[3], g3[5]]
    assert len(weights) == NUM_WEIGHTS
    return weights, vectors


def pack_param_slab(params):
    weights, vectors = _flatten_params(params)
    mats = list(weights) + [jnp.reshape(x, (1, -1)) for x in vectors]
    cols = max(m.shape[1] for m in mats)
    layout, pieces, off = [], [], 0
    for m in mats:
        r, c = m.shape
        rp = _round_up(r, 8)
        block = jnp.zeros((rp, cols), jnp.float32).at[:r, :c].set(
            m.astype(jnp.float32))
        pieces.append(block)
        layout.append((off, r, c))
        off += rp
    slab = jnp.concatenate(pieces, axis=0)
    w_layout = tuple(layout[:NUM_WEIGHTS])
    v_layout = tuple(layout[NUM_WEIGHTS:])
    return slab, w_layout, v_layout


# ----------------------------------------------------------------------------
# Full BaseGinNetwork forward (tiny JAX glue, everything hot in one kernel)
# ----------------------------------------------------------------------------
def base_gin_forward(obs, param_slab, *, w_layout, v_layout, embedding_dim):
    num_tasks = obs["task_state_scheduled"].shape[0]
    num_vms = obs["vm_completion_time"].shape[0]

    task_x = jnp.stack(
        [obs["task_state_scheduled"], obs["task_state_ready"],
         obs["task_length"], obs["task_completion_time"]], axis=-1)
    vm_x = jnp.stack(
        [obs["vm_completion_time"],
         1.0 / (obs["vm_speed"] + 1e-8),
         obs["vm_energy_rate"]], axis=-1)

    # Edge bookkeeping only (tiny int ops); adjacency / one-hot gathers are
    # built inside the kernel from these raw indices.
    task_vm_edges = obs["compatibilities"].at[1].add(num_tasks)
    edge_index = jnp.concatenate(
        [task_vm_edges, obs["task_dependencies"]], axis=-1).astype(jnp.int32)
    n_edges = edge_index.shape[1]
    edge_sd = edge_index.reshape(2 * n_edges, 1)   # (2E, 1): src rows then dst rows
    edge_dst = edge_index[1:2, :]                  # (1, E)

    return run_fused_forward(task_x, vm_x, edge_sd, edge_dst, param_slab,
                             w_layout=w_layout, v_layout=v_layout,
                             num_tasks=num_tasks, num_vms=num_vms,
                             embedding_dim=embedding_dim)


# ----------------------------------------------------------------------------
# Main
# ----------------------------------------------------------------------------
if __name__ == "__main__":
    num_tasks, num_vms = 8, 4
    hidden_dim, embedding_dim = 32, 16

    key = jax.random.PRNGKey(0)
    (k_obs_t, k_obs_v, k_task_enc, k_vm_enc,
     k_g1, k_g2, k_g3) = jax.random.split(key, 7)

    kt = jax.random.split(k_obs_t, 4)
    kv = jax.random.split(k_obs_v, 3)
    obs = {
        "task_state_scheduled": jax.random.uniform(kt[0], (num_tasks,), jnp.float32),
        "task_state_ready":     jax.random.uniform(kt[1], (num_tasks,), jnp.float32),
        "task_length":          jax.random.uniform(kt[2], (num_tasks,), jnp.float32),
        "task_completion_time": jax.random.uniform(kt[3], (num_tasks,), jnp.float32),
        "vm_completion_time":   jax.random.uniform(kv[0], (num_vms,), jnp.float32),
        "vm_speed":             jax.random.uniform(kv[1], (num_vms,), jnp.float32) + 0.5,
        "vm_energy_rate":       jax.random.uniform(kv[2], (num_vms,), jnp.float32),
        # task<->vm compatibilities: (2, 16), row0 = task idx, row1 = vm idx
        "compatibilities": jnp.stack(
            [jnp.arange(16, dtype=jnp.int32) % num_tasks,
             jnp.arange(16, dtype=jnp.int32) % num_vms], axis=0),
        # task dependency chain: (2, 7), edges i -> i+1
        "task_dependencies": jnp.stack(
            [jnp.arange(7, dtype=jnp.int32),
             jnp.arange(1, 8, dtype=jnp.int32)], axis=0),
    }

    params = {
        "task_encoder": make_encoder_params(k_task_enc, 4, hidden_dim, embedding_dim),
        "vm_encoder":   make_encoder_params(k_vm_enc, 3, hidden_dim, embedding_dim),
        # GIN(in=E, hidden=H, num_layers=3, out=E):
        "gin1": make_gin_mlp_params(k_g1, embedding_dim, hidden_dim, hidden_dim),
        "gin2": make_gin_mlp_params(k_g2, hidden_dim, hidden_dim, hidden_dim),
        "gin3": make_gin_mlp_params(k_g3, hidden_dim, embedding_dim, embedding_dim),
    }

    # Pack all parameters into one contiguous slab once (outside the hot path).
    param_slab, w_layout, v_layout = pack_param_slab(params)

    forward = jax.jit(functools.partial(
        base_gin_forward, w_layout=w_layout, v_layout=v_layout,
        embedding_dim=embedding_dim))

    node_emb, edge_emb, graph_emb = forward(obs, param_slab)
    jax.block_until_ready((node_emb, edge_emb, graph_emb))

    assert node_emb.shape == (num_tasks + num_vms, embedding_dim)
    assert edge_emb.shape == (16 + 7, 2 * embedding_dim)
    assert graph_emb.shape == (1, embedding_dim)
    assert jnp.all(jnp.isfinite(node_emb))
    assert jnp.all(jnp.isfinite(edge_emb))
    assert jnp.all(jnp.isfinite(graph_emb))
    print("KERNEL_OK")
</pallas_src>

<mosaic_0001>
module attributes {stable_mosaic.version = 11 : i64} {
  func.func @fused_gin_kernel(%arg0: memref<8x4xf32, #tpu.memory_space<vmem>>, %arg1: memref<4x3xf32, #tpu.memory_space<vmem>>, %arg2: memref<46x1xi32, #tpu.memory_space<vmem>>, %arg3: memref<1x23xi32, #tpu.memory_space<vmem>>, %arg4: memref<512x32xf32, #tpu.memory_space<vmem>>, %arg5: memref<48x128xf32, #tpu.memory_space<vmem>>) attributes {dimension_semantics = [], scalar_prefetch = 0 : i64, scratch_operands = 0 : i64, tpu.core_type = #tpu.core_type<tc>} {
    %c0 = arith.constant 0 : index
    %c0_0 = arith.constant 0 : index
    %0 = vector.load %arg0[%c0, %c0_0] : memref<8x4xf32, #tpu.memory_space<vmem>>, vector<8x4xf32>
    %c0_1 = arith.constant 0 : index
    %c0_2 = arith.constant 0 : index
    %1 = vector.load %arg4[%c0_1, %c0_2] : memref<512x32xf32, #tpu.memory_space<vmem>>, vector<4x32xf32>
    %2 = arith.truncf %1 : vector<4x32xf32> to vector<4x32xbf16>
    %3 = arith.truncf %0 : vector<8x4xf32> to vector<8x4xbf16>
    %cst = arith.constant dense<0.000000e+00> : vector<8x32xf32>
    %4 = tpu.matmul %3, %2, %cst {dimension_numbers = #tpu.dot_dimension_numbers<[1], [0], [0], [1], [0, 0, 1, 1], [], []>} : vector<8x4xbf16>, vector<4x32xbf16>, vector<8x32xf32> -> vector<8x32xf32>
    %c304 = arith.constant 304 : index
    %c0_3 = arith.constant 0 : index
    %5 = vector.load %arg4[%c304, %c0_3] : memref<512x32xf32, #tpu.memory_space<vmem>>, vector<1x32xf32>
    %6 = vector.broadcast %5 : vector<1x32xf32> to vector<8x32xf32>
    %7 = arith.addf %4, %6 : vector<8x32xf32>
    %c312 = arith.constant 312 : index
    %c0_4 = arith.constant 0 : index
    %8 = vector.load %arg4[%c312, %c0_4] : memref<512x32xf32, #tpu.memory_space<vmem>>, vector<1x32xf32>
    %c320 = arith.constant 320 : index
    %c0_5 = arith.constant 0 : index
    %9 = vector.load %arg4[%c320, %c0_5] : memref<512x32xf32, #tpu.memory_space<vmem>>, vector<1x32xf32>
    %cst_6 = arith.constant dense<0.000000e+00> : vector<32xf32>
    %10 = vector.multi_reduction <add>, %7, %cst_6 [0] : vector<8x32xf32> to vector<32xf32>
    %11 = vector.shape_cast %10 : vector<32xf32> to vector<1x32xf32>
    %cst_7 = arith.constant 1.250000e-01 : f32
    %12 = vector.broadcast %cst_7 : f32 to vector<1x32xf32>
    %13 = arith.mulf %11, %12 : vector<1x32xf32>
    %14 = arith.mulf %7, %7 : vector<8x32xf32>
    %cst_8 = arith.constant dense<0.000000e+00> : vector<32xf32>
    %15 = vector.multi_reduction <add>, %14, %cst_8 [0] : vector<8x32xf32> to vector<32xf32>
    %16 = vector.shape_cast %15 : vector<32xf32> to vector<1x32xf32>
    %cst_9 = arith.constant 1.250000e-01 : f32
    %17 = vector.broadcast %cst_9 : f32 to vector<1x32xf32>
    %18 = arith.mulf %16, %17 : vector<1x32xf32>
    %19 = arith.mulf %13, %13 : vector<1x32xf32>
    %20 = arith.subf %18, %19 : vector<1x32xf32>
    %cst_10 = arith.constant 0.000000e+00 : f32
    %21 = vector.broadcast %cst_10 : f32 to vector<1x32xf32>
    %22 = arith.maximumf %20, %21 : vector<1x32xf32>
    %cst_11 = arith.constant 9.99999974E-6 : f32
    %23 = vector.broadcast %cst_11 : f32 to vector<1x32xf32>
    %24 = arith.addf %22, %23 : vector<1x32xf32>
    %25 = math.rsqrt %24 : vector<1x32xf32>
    %26 = arith.mulf %8, %25 : vector<1x32xf32>
    %27 = vector.broadcast %26 : vector<1x32xf32> to vector<8x32xf32>
    %28 = arith.mulf %7, %27 : vector<8x32xf32>
    %29 = arith.mulf %13, %26 : vector<1x32xf32>
    %30 = arith.subf %9, %29 : vector<1x32xf32>
    %31 = vector.broadcast %30 : vector<1x32xf32> to vector<8x32xf32>
    %32 = arith.addf %28, %31 : vector<8x32xf32>
    %cst_12 = arith.constant 0.000000e+00 : f32
    %33 = vector.broadcast %cst_12 : f32 to vector<8x32xf32>
    %34 = arith.maximumf %32, %33 : vector<8x32xf32>
    %c8 = arith.constant 8 : index
    %c0_13 = arith.constant 0 : index
    %35 = vector.load %arg4[%c8, %c0_13] : memref<512x32xf32, #tpu.memory_space<vmem>>, vector<32x32xf32>
    %36 = arith.truncf %35 : vector<32x32xf32> to vector<32x32xbf16>
    %37 = arith.truncf %34 : vector<8x32xf32> to vector<8x32xbf16>
    %cst_14 = arith.constant dense<0.000000e+00> : vector<8x32xf32>
    %38 = tpu.matmul %37, %36, %cst_14 {dimension_numbers = #tpu.dot_dimension_numbers<[1], [0], [0], [1], [0, 0, 1, 1], [], []>} : vector<8x32xbf16>, vector<32x32xbf16>, vector<8x32xf32> -> vector<8x32xf32>
    %c328 = arith.constant 328 : index
    %c0_15 = arith.constant 0 : index
    %39 = vector.load %arg4[%c328, %c0_15] : memref<512x32xf32, #tpu.memory_space<vmem>>, vector<1x32xf32>
    %40 = vector.broadcast %39 : vector<1x32xf32> to vector<8x32xf32>
    %41 = arith.addf %38, %40 : vector<8x32xf32>
    %c336 = arith.constant 336 : index
    %c0_16 = arith.constant 0 : index
    %42 = vector.load %arg4[%c336, %c0_16] : memref<512x32xf32, #tpu.memory_space<vmem>>, vector<1x32xf32>
    %c344 = arith.constant 344 : index
    %c0_17 = arith.constant 0 : index
    %43 = vector.load %arg4[%c344, %c0_17] : memref<512x32xf32, #tpu.memory_space<vmem>>, vector<1x32xf32>
    %cst_18 = arith.constant dense<0.000000e+00> : vector<32xf32>
    %44 = vector.multi_reduction <add>, %41, %cst_18 [0] : vector<8x32xf32> to vector<32xf32>
    %45 = vector.shape_cast %44 : vector<32xf32> to vector<1x32xf32>
    %cst_19 = arith.constant 1.250000e-01 : f32
    %46 = vector.broadcast %cst_19 : f32 to vector<1x32xf32>
    %47 = arith.mulf %45, %46 : vector<1x32xf32>
    %48 = arith.mulf %41, %41 : vector<8x32xf32>
    %cst_20 = arith.constant dense<0.000000e+00> : vector<32xf32>
    %49 = vector.multi_reduction <add>, %48, %cst_20 [0] : vector<8x32xf32> to vector<32xf32>
    %50 = vector.shape_cast %49 : vector<32xf32> to vector<1x32xf32>
    %cst_21 = arith.constant 1.250000e-01 : f32
    %51 = vector.broadcast %cst_21 : f32 to vector<1x32xf32>
    %52 = arith.mulf %50, %51 : vector<1x32xf32>
    %53 = arith.mulf %47, %47 : vector<1x32xf32>
    %54 = arith.subf %52, %53 : vector<1x32xf32>
    %cst_22 = arith.constant 0.000000e+00 : f32
    %55 = vector.broadcast %cst_22 : f32 to vector<1x32xf32>
    %56 = arith.maximumf %54, %55 : vector<1x32xf32>
    %cst_23 = arith.constant 9.99999974E-6 : f32
    %57 = vector.broadcast %cst_23 : f32 to vector<1x32xf32>
    %58 = arith.addf %56, %57 : vector<1x32xf32>
    %59 = math.rsqrt %58 : vector<1x32xf32>
    %60 = arith.mulf %42, %59 : vector<1x32xf32>
    %61 = vector.broadcast %60 : vector<1x32xf32> to vector<8x32xf32>
    %62 = arith.mulf %41, %61 : vector<8x32xf32>
    %63 = arith.mulf %47, %60 : vector<1x32xf32>
    %64 = arith.subf %43, %63 : vector<1x32xf32>
    %65 = vector.broadcast %64 : vector<1x32xf32> to vector<8x32xf32>
    %66 = arith.addf %62, %65 : vector<8x32xf32>
    %cst_24 = arith.constant 0.000000e+00 : f32
    %67 = vector.broadcast %cst_24 : f32 to vector<8x32xf32>
    %68 = arith.maximumf %66, %67 : vector<8x32xf32>
    %c40 = arith.constant 40 : index
    %c0_25 = arith.constant 0 : index
    %69 = vector.load %arg4[%c40, %c0_25] : memref<512x32xf32, #tpu.memory_space<vmem>>, vector<32x16xf32>
    %70 = arith.truncf %69 : vector<32x16xf32> to vector<32x16xbf16>
    %71 = arith.truncf %68 : vector<8x32xf32> to vector<8x32xbf16>
    %cst_26 = arith.constant dense<0.000000e+00> : vector<8x16xf32>
    %72 = tpu.matmul %71, %70, %cst_26 {dimension_numbers = #tpu.dot_dimension_numbers<[1], [0], [0], [1], [0, 0, 1, 1], [], []>} : vector<8x32xbf16>, vector<32x16xbf16>, vector<8x16xf32> -> vector<8x16xf32>
    %c352 = arith.constant 352 : index
    %c0_27 = arith.constant 0 : index
    %73 = vector.load %arg4[%c352, %c0_27] : memref<512x32xf32, #tpu.memory_space<vmem>>, vector<1x16xf32>
    %74 = vector.broadcast %73 : vector<1x16xf32> to vector<8x16xf32>
    %75 = arith.addf %72, %74 : vector<8x16xf32>
    %c0_28 = arith.constant 0 : index
    %c0_29 = arith.constant 0 : index
    %76 = vector.load %arg1[%c0_28, %c0_29] : memref<4x3xf32, #tpu.memory_space<vmem>>, vector<4x3xf32>
    %c72 = arith.constant 72 : index
    %c0_30 = arith.constant 0 : index
    %77 = vector.load %arg4[%c72, %c0_30] : memref<512x32xf32, #tpu.memory_space<vmem>>, vector<3x32xf32>
    %78 = arith.truncf %77 : vector<3x32xf32> to vector<3x32xbf16>
    %79 = arith.truncf %76 : vector<4x3xf32> to vector<4x3xbf16>
    %cst_31 = arith.constant dense<0.000000e+00> : vector<4x32xf32>
    %80 = tpu.matmul %79, %78, %cst_31 {dimension_numbers = #tpu.dot_dimension_numbers<[1], [0], [0], [1], [0, 0, 1, 1], [], []>} : vector<4x3xbf16>, vector<3x32xbf16>, vector<4x32xf32> -> vector<4x32xf32>
    %c360 = arith.constant 360 : index
    %c0_32 = arith.constant 0 : index
    %81 = vector.load %arg4[%c360, %c0_32] : memref<512x32xf32, #tpu.memory_space<vmem>>, vector<1x32xf32>
    %82 = vector.broadcast %81 : vector<1x32xf32> to vector<4x32xf32>
    %83 = arith.addf %80, %82 : vector<4x32xf32>
    %c368 = arith.constant 368 : index
    %c0_33 = arith.constant 0 : index
    %84 = vector.load %arg4[%c368, %c0_33] : memref<512x32xf32, #tpu.memory_space<vmem>>, vector<1x32xf32>
    %c376 = arith.constant 376 : index
    %c0_34 = arith.constant 0 : index
    %85 = vector.load %arg4[%c376, %c0_34] : memref<512x32xf32, #tpu.memory_space<vmem>>, vector<1x32xf32>
    %cst_35 = arith.constant dense<0.000000e+00> : vector<32xf32>
    %86 = vector.multi_reduction <add>, %83, %cst_35 [0] : vector<4x32xf32> to vector<32xf32>
    %87 = vector.shape_cast %86 : vector<32xf32> to vector<1x32xf32>
    %cst_36 = arith.constant 2.500000e-01 : f32
    %88 = vector.broadcast %cst_36 : f32 to vector<1x32xf32>
    %89 = arith.mulf %87, %88 : vector<1x32xf32>
    %90 = arith.mulf %83, %83 : vector<4x32xf32>
    %cst_37 = arith.constant dense<0.000000e+00> : vector<32xf32>
    %91 = vector.multi_reduction <add>, %90, %cst_37 [0] : vector<4x32xf32> to vector<32xf32>
    %92 = vector.shape_cast %91 : vector<32xf32> to vector<1x32xf32>
    %cst_38 = arith.constant 2.500000e-01 : f32
    %93 = vector.broadcast %cst_38 : f32 to vector<1x32xf32>
    %94 = arith.mulf %92, %93 : vector<1x32xf32>
    %95 = arith.mulf %89, %89 : vector<1x32xf32>
    %96 = arith.subf %94, %95 : vector<1x32xf32>
    %cst_39 = arith.constant 0.000000e+00 : f32
    %97 = vector.broadcast %cst_39 : f32 to vector<1x32xf32>
    %98 = arith.maximumf %96, %97 : vector<1x32xf32>
    %cst_40 = arith.constant 9.99999974E-6 : f32
    %99 = vector.broadcast %cst_40 : f32 to vector<1x32xf32>
    %100 = arith.addf %98, %99 : vector<1x32xf32>
    %101 = math.rsqrt %100 : vector<1x32xf32>
    %102 = arith.mulf %84, %101 : vector<1x32xf32>
    %103 = vector.broadcast %102 : vector<1x32xf32> to vector<4x32xf32>
    %104 = arith.mulf %83, %103 : vector<4x32xf32>
    %105 = arith.mulf %89, %102 : vector<1x32xf32>
    %106 = arith.subf %85, %105 : vector<1x32xf32>
    %107 = vector.broadcast %106 : vector<1x32xf32> to vector<4x32xf32>
    %108 = arith.addf %104, %107 : vector<4x32xf32>
    %cst_41 = arith.constant 0.000000e+00 : f32
    %109 = vector.broadcast %cst_41 : f32 to vector<4x32xf32>
    %110 = arith.maximumf %108, %109 : vector<4x32xf32>
    %c80 = arith.constant 80 : index
    %c0_42 = arith.constant 0 : index
    %111 = vector.load %arg4[%c80, %c0_42] : memref<512x32xf32, #tpu.memory_space<vmem>>, vector<32x32xf32>
    %112 = arith.truncf %111 : vector<32x32xf32> to vector<32x32xbf16>
    %113 = arith.truncf %110 : vector<4x32xf32> to vector<4x32xbf16>
    %cst_43 = arith.constant dense<0.000000e+00> : vector<4x32xf32>
    %114 = tpu.matmul %113, %112, %cst_43 {dimension_numbers = #tpu.dot_dimension_numbers<[1], [0], [0], [1], [0, 0, 1, 1], [], []>} : vector<4x32xbf16>, vector<32x32xbf16>, vector<4x32xf32> -> vector<4x32xf32>
    %c384 = arith.constant 384 : index
    %c0_44 = arith.constant 0 : index
    %115 = vector.load %arg4[%c384, %c0_44] : memref<512x32xf32, #tpu.memory_space<vmem>>, vector<1x32xf32>
    %116 = vector.broadcast %115 : vector<1x32xf32> to vector<4x32xf32>
    %117 = arith.addf %114, %116 : vector<4x32xf32>
    %c392 = arith.constant 392 : index
    %c0_45 = arith.constant 0 : index
    %118 = vector.load %arg4[%c392, %c0_45] : memref<512x32xf32, #tpu.memory_space<vmem>>, vector<1x32xf32>
    %c400 = arith.constant 400 : index
    %c0_46 = arith.constant 0 : index
    %119 = vector.load %arg4[%c400, %c0_46] : memref<512x32xf32, #tpu.memory_space<vmem>>, vector<1x32xf32>
    %cst_47 = arith.constant dense<0.000000e+00> : vector<32xf32>
    %120 = vector.multi_reduction <add>, %117, %cst_47 [0] : vector<4x32xf32> to vector<32xf32>
    %121 = vector.shape_cast %120 : vector<32xf32> to vector<1x32xf32>
    %cst_48 = arith.constant 2.500000e-01 : f32
    %122 = vector.broadcast %cst_48 : f32 to vector<1x32xf32>
    %123 = arith.mulf %121, %122 : vector<1x32xf32>
    %124 = arith.mulf %117, %117 : vector<4x32xf32>
    %cst_49 = arith.constant dense<0.000000e+00> : vector<32xf32>
    %125 = vector.multi_reduction <add>, %124, %cst_49 [0] : vector<4x32xf32> to vector<32xf32>
    %126 = vector.shape_cast %125 : vector<32xf32> to vector<1x32xf32>
    %cst_50 = arith.constant 2.500000e-01 : f32
    %127 = vector.broadcast %cst_50 : f32 to vector<1x32xf32>
    %128 = arith.mulf %126, %127 : vector<1x32xf32>
    %129 = arith.mulf %123, %123 : vector<1x32xf32>
    %130 = arith.subf %128, %129 : vector<1x32xf32>
    %cst_51 = arith.constant 0.000000e+00 : f32
    %131 = vector.broadcast %cst_51 : f32 to vector<1x32xf32>
    %132 = arith.maximumf %130, %131 : vector<1x32xf32>
    %cst_52 = arith.constant 9.99999974E-6 : f32
    %133 = vector.broadcast %cst_52 : f32 to vector<1x32xf32>
    %134 = arith.addf %132, %133 : vector<1x32xf32>
    %135 = math.rsqrt %134 : vector<1x32xf32>
    %136 = arith.mulf %118, %135 : vector<1x32xf32>
    %137 = vector.broadcast %136 : vector<1x32xf32> to vector<4x32xf32>
    %138 = arith.mulf %117, %137 : vector<4x32xf32>
    %139 = arith.mulf %123, %136 : vector<1x32xf32>
    %140 = arith.subf %119, %139 : vector<1x32xf32>
    %141 = vector.broadcast %140 : vector<1x32xf32> to vector<4x32xf32>
    %142 = arith.addf %138, %141 : vector<4x32xf32>
    %cst_53 = arith.constant 0.000000e+00 : f32
    %143 = vector.broadcast %cst_53 : f32 to vector<4x32xf32>
    %144 = arith.maximumf %142, %143 : vector<4x32xf32>
    %c112 = arith.constant 112 : index
    %c0_54 = arith.constant 0 : index
    %145 = vector.load %arg4[%c112, %c0_54] : memref<512x32xf32, #tpu.memory_space<vmem>>, vector<32x16xf32>
    %146 = arith.truncf %145 : vector<32x16xf32> to vector<32x16xbf16>
    %147 = arith.truncf %144 : vector<4x32xf32> to vector<4x32xbf16>
    %cst_55 = arith.constant dense<0.000000e+00> : vector<4x16xf32>
    %148 = tpu.matmul %147, %146, %cst_55 {dimension_numbers = #tpu.dot_dimension_numbers<[1], [0], [0], [1], [0, 0, 1, 1], [], []>} : vector<4x32xbf16>, vector<32x16xbf16>, vector<4x16xf32> -> vector<4x16xf32>
    %c408 = arith.constant 408 : index
    %c0_56 = arith.constant 0 : index
    %149 = vector.load %arg4[%c408, %c0_56] : memref<512x32xf32, #tpu.memory_space<vmem>>, vector<1x16xf32>
    %150 = vector.broadcast %149 : vector<1x16xf32> to vector<4x16xf32>
    %151 = arith.addf %148, %150 : vector<4x16xf32>
    %152 = tpu.concatenate %75, %151 in 0 : vector<8x16xf32>, vector<4x16xf32> -> vector<12x16xf32>
    %c0_57 = arith.constant 0 : index
    %c0_58 = arith.constant 0 : index
    %153 = vector.load %arg2[%c0_57, %c0_58] : memref<46x1xi32, #tpu.memory_space<vmem>>, vector<46x1xi32>
    %154 = tpu.iota {dimensions = array<i32: 1>} : vector<46x12xi32>
    %155 = vector.broadcast %153 : vector<46x1xi32> to vector<46x12xi32>
    %156 = arith.cmpi eq, %155, %154 : vector<46x12xi32>
    %157 = arith.extui %156 : vector<46x12xi1> to vector<46x12xi32>
    %158 = arith.sitofp %157 : vector<46x12xi32> to vector<46x12xf32>
    %159 = vector.extract_strided_slice %158 {offsets = [0, 0], sizes = [23, 12], strides = [1, 1]} : vector<46x12xf32> to vector<23x12xf32>
    %c0_59 = arith.constant 0 : index
    %c0_60 = arith.constant 0 : index
    %160 = vector.load %arg3[%c0_59, %c0_60] : memref<1x23xi32, #tpu.memory_space<vmem>>, vector<1x23xi32>
    %161 = tpu.iota {dimensions = array<i32: 0>} : vector<12x23xi32>
    %162 = vector.broadcast %160 : vector<1x23xi32> to vector<12x23xi32>
    %163 = arith.cmpi eq, %162, %161 : vector<12x23xi32>
    %164 = arith.extui %163 : vector<12x23xi1> to vector<12x23xi32>
    %165 = arith.sitofp %164 : vector<12x23xi32> to vector<12x23xf32>
    %166 = tpu.iota {dimensions = array<i32: 0>} : vector<12x12xi32>
    %167 = tpu.iota {dimensions = array<i32: 1>} : vector<12x12xi32>
    %168 = arith.cmpi eq, %166, %167 : vector<12x12xi32>
    %169 = arith.extui %168 : vector<12x12xi1> to vector<12x12xi32>
    %170 = arith.sitofp %169 : vector<12x12xi32> to vector<12x12xf32>
    %cst_61 = arith.constant dense<0.000000e+00> : vector<12x12xf32>
    %171 = tpu.matmul %165, %159, %cst_61 {dimension_numbers = #tpu.dot_dimension_numbers<[1], [0], [0], [1], [0, 0, 1, 1], [], []>} : vector<12x23xf32>, vector<23x12xf32>, vector<12x12xf32> -> vector<12x12xf32>
    %172 = arith.addf %171, %170 : vector<12x12xf32>
    %173 = arith.truncf %172 : vector<12x12xf32> to vector<12x12xbf16>
    %174 = arith.truncf %152 : vector<12x16xf32> to vector<12x16xbf16>
    %cst_62 = arith.constant dense<0.000000e+00> : vector<12x16xf32>
    %175 = tpu.matmul %173, %174, %cst_62 {dimension_numbers = #tpu.dot_dimension_numbers<[1], [0], [0], [1], [0, 0, 1, 1], [], []>} : vector<12x12xbf16>, vector<12x16xbf16>, vector<12x16xf32> -> vector<12x16xf32>
    %c144 = arith.constant 144 : index
    %c0_63 = arith.constant 0 : index
    %176 = vector.load %arg4[%c144, %c0_63] : memref<512x32xf32, #tpu.memory_space<vmem>>, vector<16x32xf32>
    %177 = arith.truncf %176 : vector<16x32xf32> to vector<16x32xbf16>
    %178 = arith.truncf %175 : vector<12x16xf32> to vector<12x16xbf16>
    %cst_64 = arith.constant dense<0.000000e+00> : vector<12x32xf32>
    %179 = tpu.matmul %178, %177, %cst_64 {dimension_numbers = #tpu.dot_dimension_numbers<[1], [0], [0], [1], [0, 0, 1, 1], [], []>} : vector<12x16xbf16>, vector<16x32xbf16>, vector<12x32xf32> -> vector<12x32xf32>
    %c416 = arith.constant 416 : index
    %c0_65 = arith.constant 0 : index
    %180 = vector.load %arg4[%c416, %c0_65] : memref<512x32xf32, #tpu.memory_space<vmem>>, vector<1x32xf32>
    %181 = vector.broadcast %180 : vector<1x32xf32> to vector<12x32xf32>
    %182 = arith.addf %179, %181 : vector<12x32xf32>
    %c424 = arith.constant 424 : index
    %c0_66 = arith.constant 0 : index
    %183 = vector.load %arg4[%c424, %c0_66] : memref<512x32xf32, #tpu.memory_space<vmem>>, vector<1x32xf32>
    %c432 = arith.constant 432 : index
    %c0_67 = arith.constant 0 : index
    %184 = vector.load %arg4[%c432, %c0_67] : memref<512x32xf32, #tpu.memory_space<vmem>>, vector<1x32xf32>
    %cst_68 = arith.constant dense<0.000000e+00> : vector<32xf32>
    %185 = vector.multi_reduction <add>, %182, %cst_68 [0] : vector<12x32xf32> to vector<32xf32>
    %186 = vector.shape_cast %185 : vector<32xf32> to vector<1x32xf32>
    %cst_69 = arith.constant 0.0833333358 : f32
    %187 = vector.broadcast %cst_69 : f32 to vector<1x32xf32>
    %188 = arith.mulf %186, %187 : vector<1x32xf32>
    %189 = arith.mulf %182, %182 : vector<12x32xf32>
    %cst_70 = arith.constant dense<0.000000e+00> : vector<32xf32>
    %190 = vector.multi_reduction <add>, %189, %cst_70 [0] : vector<12x32xf32> to vector<32xf32>
    %191 = vector.shape_cast %190 : vector<32xf32> to vector<1x32xf32>
    %cst_71 = arith.constant 0.0833333358 : f32
    %192 = vector.broadcast %cst_71 : f32 to vector<1x32xf32>
    %193 = arith.mulf %191, %192 : vector<1x32xf32>
    %194 = arith.mulf %188, %188 : vector<1x32xf32>
    %195 = arith.subf %193, %194 : vector<1x32xf32>
    %cst_72 = arith.constant 0.000000e+00 : f32
    %196 = vector.broadcast %cst_72 : f32 to vector<1x32xf32>
    %197 = arith.maximumf %195, %196 : vector<1x32xf32>
    %cst_73 = arith.constant 9.99999974E-6 : f32
    %198 = vector.broadcast %cst_73 : f32 to vector<1x32xf32>
    %199 = arith.addf %197, %198 : vector<1x32xf32>
    %200 = math.rsqrt %199 : vector<1x32xf32>
    %201 = arith.mulf %183, %200 : vector<1x32xf32>
    %202 = vector.broadcast %201 : vector<1x32xf32> to vector<12x32xf32>
    %203 = arith.mulf %182, %202 : vector<12x32xf32>
    %204 = arith.mulf %188, %201 : vector<1x32xf32>
    %205 = arith.subf %184, %204 : vector<1x32xf32>
    %206 = vector.broadcast %205 : vector<1x32xf32> to vector<12x32xf32>
    %207 = arith.addf %203, %206 : vector<12x32xf32>
    %cst_74 = arith.constant 0.000000e+00 : f32
    %208 = vector.broadcast %cst_74 : f32 to vector<12x32xf32>
    %209 = arith.maximumf %207, %208 : vector<12x32xf32>
    %c160 = arith.constant 160 : index
    %c0_75 = arith.constant 0 : index
    %210 = vector.load %arg4[%c160, %c0_75] : memref<512x32xf32, #tpu.memory_space<vmem>>, vector<32x32xf32>
    %211 = arith.truncf %210 : vector<32x32xf32> to vector<32x32xbf16>
    %212 = arith.truncf %209 : vector<12x32xf32> to vector<12x32xbf16>
    %cst_76 = arith.constant dense<0.000000e+00> : vector<12x32xf32>
    %213 = tpu.matmul %212, %211, %cst_76 {dimension_numbers = #tpu.dot_dimension_numbers<[1], [0], [0], [1], [0, 0, 1, 1], [], []>} : vector<12x32xbf16>, vector<32x32xbf16>, vector<12x32xf32> -> vector<12x32xf32>
    %c440 = arith.constant 440 : index
    %c0_77 = arith.constant 0 : index
    %214 = vector.load %arg4[%c440, %c0_77] : memref<512x32xf32, #tpu.memory_space<vmem>>, vector<1x32xf32>
    %215 = vector.broadcast %214 : vector<1x32xf32> to vector<12x32xf32>
    %216 = arith.addf %213, %215 : vector<12x32xf32>
    %cst_78 = arith.constant 0.000000e+00 : f32
    %217 = vector.broadcast %cst_78 : f32 to vector<12x32xf32>
    %218 = arith.maximumf %216, %217 : vector<12x32xf32>
    %219 = arith.truncf %218 : vector<12x32xf32> to vector<12x32xbf16>
    %cst_79 = arith.constant dense<0.000000e+00> : vector<12x32xf32>
    %220 = tpu.matmul %173, %219, %cst_79 {dimension_numbers = #tpu.dot_dimension_numbers<[1], [0], [0], [1], [0, 0, 1, 1], [], []>} : vector<12x12xbf16>, vector<12x32xbf16>, vector<12x32xf32> -> vector<12x32xf32>
    %c192 = arith.constant 192 : index
    %c0_80 = arith.constant 0 : index
    %221 = vector.load %arg4[%c192, %c0_80] : memref<512x32xf32, #tpu.memory_space<vmem>>, vector<32x32xf32>
    %222 = arith.truncf %221 : vector<32x32xf32> to vector<32x32xbf16>
    %223 = arith.truncf %220 : vector<12x32xf32> to vector<12x32xbf16>
    %cst_81 = arith.constant dense<0.000000e+00> : vector<12x32xf32>
    %224 = tpu.matmul %223, %222, %cst_81 {dimension_numbers = #tpu.dot_dimension_numbers<[1], [0], [0], [1], [0, 0, 1, 1], [], []>} : vector<12x32xbf16>, vector<32x32xbf16>, vector<12x32xf32> -> vector<12x32xf32>
    %c448 = arith.constant 448 : index
    %c0_82 = arith.constant 0 : index
    %225 = vector.load %arg4[%c448, %c0_82] : memref<512x32xf32, #tpu.memory_space<vmem>>, vector<1x32xf32>
    %226 = vector.broadcast %225 : vector<1x32xf32> to vector<12x32xf32>
    %227 = arith.addf %224, %226 : vector<12x32xf32>
    %c456 = arith.constant 456 : index
    %c0_83 = arith.constant 0 : index
    %228 = vector.load %arg4[%c456, %c0_83] : memref<512x32xf32, #tpu.memory_space<vmem>>, vector<1x32xf32>
    %c464 = arith.constant 464 : index
    %c0_84 = arith.constant 0 : index
    %229 = vector.load %arg4[%c464, %c0_84] : memref<512x32xf32, #tpu.memory_space<vmem>>, vector<1x32xf32>
    %cst_85 = arith.constant dense<0.000000e+00> : vector<32xf32>
    %230 = vector.multi_reduction <add>, %227, %cst_85 [0] : vector<12x32xf32> to vector<32xf32>
    %231 = vector.shape_cast %230 : vector<32xf32> to vector<1x32xf32>
    %cst_86 = arith.constant 0.0833333358 : f32
    %232 = vector.broadcast %cst_86 : f32 to vector<1x32xf32>
    %233 = arith.mulf %231, %232 : vector<1x32xf32>
    %234 = arith.mulf %227, %227 : vector<12x32xf32>
    %cst_87 = arith.constant dense<0.000000e+00> : vector<32xf32>
    %235 = vector.multi_reduction <add>, %234, %cst_87 [0] : vector<12x32xf32> to vector<32xf32>
    %236 = vector.shape_cast %235 : vector<32xf32> to vector<1x32xf32>
    %cst_88 = arith.constant 0.0833333358 : f32
    %237 = vector.broadcast %cst_88 : f32 to vector<1x32xf32>
    %238 = arith.mulf %236, %237 : vector<1x32xf32>
    %239 = arith.mulf %233, %233 : vector<1x32xf32>
    %240 = arith.subf %238, %239 : vector<1x32xf32>
    %cst_89 = arith.constant 0.000000e+00 : f32
    %241 = vector.broadcast %cst_89 : f32 to vector<1x32xf32>
    %242 = arith.maximumf %240, %241 : vector<1x32xf32>
    %cst_90 = arith.constant 9.99999974E-6 : f32
    %243 = vector.broadcast %cst_90 : f32 to vector<1x32xf32>
    %244 = arith.addf %242, %243 : vector<1x32xf32>
    %245 = math.rsqrt %244 : vector<1x32xf32>
    %246 = arith.mulf %228, %245 : vector<1x32xf32>
    %247 = vector.broadcast %246 : vector<1x32xf32> to vector<12x32xf32>
    %248 = arith.mulf %227, %247 : vector<12x32xf32>
    %249 = arith.mulf %233, %246 : vector<1x32xf32>
    %250 = arith.subf %229, %249 : vector<1x32xf32>
    %251 = vector.broadcast %250 : vector<1x32xf32> to vector<12x32xf32>
    %252 = arith.addf %248, %251 : vector<12x32xf32>
    %cst_91 = arith.constant 0.000000e+00 : f32
    %253 = vector.broadcast %cst_91 : f32 to vector<12x32xf32>
    %254 = arith.maximumf %252, %253 : vector<12x32xf32>
    %c224 = arith.constant 224 : index
    %c0_92 = arith.constant 0 : index
    %255 = vector.load %arg4[%c224, %c0_92] : memref<512x32xf32, #tpu.memory_space<vmem>>, vector<32x32xf32>
    %256 = arith.truncf %255 : vector<32x32xf32> to vector<32x32xbf16>
    %257 = arith.truncf %254 : vector<12x32xf32> to vector<12x32xbf16>
    %cst_93 = arith.constant dense<0.000000e+00> : vector<12x32xf32>
    %258 = tpu.matmul %257, %256, %cst_93 {dimension_numbers = #tpu.dot_dimension_numbers<[1], [0], [0], [1], [0, 0, 1, 1], [], []>} : vector<12x32xbf16>, vector<32x32xbf16>, vector<12x32xf32> -> vector<12x32xf32>
    %c472 = arith.constant 472 : index
    %c0_94 = arith.constant 0 : index
    %259 = vector.load %arg4[%c472, %c0_94] : memref<512x32xf32, #tpu.memory_space<vmem>>, vector<1x32xf32>
    %260 = vector.broadcast %259 : vector<1x32xf32> to vector<12x32xf32>
    %261 = arith.addf %258, %260 : vector<12x32xf32>
    %cst_95 = arith.constant 0.000000e+00 : f32
    %262 = vector.broadcast %cst_95 : f32 to vector<12x32xf32>
    %263 = arith.maximumf %261, %262 : vector<12x32xf32>
    %264 = arith.truncf %263 : vector<12x32xf32> to vector<12x32xbf16>
    %cst_96 = arith.constant dense<0.000000e+00> : vector<12x32xf32>
    %265 = tpu.matmul %173, %264, %cst_96 {dimension_numbers = #tpu.dot_dimension_numbers<[1], [0], [0], [1], [0, 0, 1, 1], [], []>} : vector<12x12xbf16>, vector<12x32xbf16>, vector<12x32xf32> -> vector<12x32xf32>
    %c256 = arith.constant 256 : index
    %c0_97 = arith.constant 0 : index
    %266 = vector.load %arg4[%c256, %c0_97] : memref<512x32xf32, #tpu.memory_space<vmem>>, vector<32x16xf32>
    %267 = arith.truncf %266 : vector<32x16xf32> to vector<32x16xbf16>
    %268 = arith.truncf %265 : vector<12x32xf32> to vector<12x32xbf16>
    %cst_98 = arith.constant dense<0.000000e+00> : vector<12x16xf32>
    %269 = tpu.matmul %268, %267, %cst_98 {dimension_numbers = #tpu.dot_dimension_numbers<[1], [0], [0], [1], [0, 0, 1, 1], [], []>} : vector<12x32xbf16>, vector<32x16xbf16>, vector<12x16xf32> -> vector<12x16xf32>
    %c480 = arith.constant 480 : index
    %c0_99 = arith.constant 0 : index
    %270 = vector.load %arg4[%c480, %c0_99] : memref<512x32xf32, #tpu.memory_space<vmem>>, vector<1x16xf32>
    %271 = vector.broadcast %270 : vector<1x16xf32> to vector<12x16xf32>
    %272 = arith.addf %269, %271 : vector<12x16xf32>
    %c488 = arith.constant 488 : index
    %c0_100 = arith.constant 0 : index
    %273 = vector.load %arg4[%c488, %c0_100] : memref<512x32xf32, #tpu.memory_space<vmem>>, vector<1x16xf32>
    %c496 = arith.constant 496 : index
    %c0_101 = arith.constant 0 : index
    %274 = vector.load %arg4[%c496, %c0_101] : memref<512x32xf32, #tpu.memory_space<vmem>>, vector<1x16xf32>
    %cst_102 = arith.constant dense<0.000000e+00> : vector<16xf32>
    %275 = vector.multi_reduction <add>, %272, %cst_102 [0] : vector<12x16xf32> to vector<16xf32>
    %276 = vector.shape_cast %275 : vector<16xf32> to vector<1x16xf32>
    %cst_103 = arith.constant 0.0833333358 : f32
    %277 = vector.broadcast %cst_103 : f32 to vector<1x16xf32>
    %278 = arith.mulf %276, %277 : vector<1x16xf32>
    %279 = arith.mulf %272, %272 : vector<12x16xf32>
    %cst_104 = arith.constant dense<0.000000e+00> : vector<16xf32>
    %280 = vector.multi_reduction <add>, %279, %cst_104 [0] : vector<12x16xf32> to vector<16xf32>
    %281 = vector.shape_cast %280 : vector<16xf32> to vector<1x16xf32>
    %cst_105 = arith.constant 0.0833333358 : f32
    %282 = vector.broadcast %cst_105 : f32 to vector<1x16xf32>
    %283 = arith.mulf %281, %282 : vector<1x16xf32>
    %284 = arith.mulf %278, %278 : vector<1x16xf32>
    %285 = arith.subf %283, %284 : vector<1x16xf32>
    %cst_106 = arith.constant 0.000000e+00 : f32
    %286 = vector.broadcast %cst_106 : f32 to vector<1x16xf32>
    %287 = arith.maximumf %285, %286 : vector<1x16xf32>
    %cst_107 = arith.constant 9.99999974E-6 : f32
    %288 = vector.broadcast %cst_107 : f32 to vector<1x16xf32>
    %289 = arith.addf %287, %288 : vector<1x16xf32>
    %290 = math.rsqrt %289 : vector<1x16xf32>
    %291 = arith.mulf %273, %290 : vector<1x16xf32>
    %292 = vector.broadcast %291 : vector<1x16xf32> to vector<12x16xf32>
    %293 = arith.mulf %272, %292 : vector<12x16xf32>
    %294 = arith.mulf %278, %291 : vector<1x16xf32>
    %295 = arith.subf %274, %294 : vector<1x16xf32>
    %296 = vector.broadcast %295 : vector<1x16xf32> to vector<12x16xf32>
    %297 = arith.addf %293, %296 : vector<12x16xf32>
    %cst_108 = arith.constant 0.000000e+00 : f32
    %298 = vector.broadcast %cst_108 : f32 to vector<12x16xf32>
    %299 = arith.maximumf %297, %298 : vector<12x16xf32>
    %c288 = arith.constant 288 : index
    %c0_109 = arith.constant 0 : index
    %300 = vector.load %arg4[%c288, %c0_109] : memref<512x32xf32, #tpu.memory_space<vmem>>, vector<16x16xf32>
    %301 = arith.truncf %300 : vector<16x16xf32> to vector<16x16xbf16>
    %302 = arith.truncf %299 : vector<12x16xf32> to vector<12x16xbf16>
    %cst_110 = arith.constant dense<0.000000e+00> : vector<12x16xf32>
    %303 = tpu.matmul %302, %301, %cst_110 {dimension_numbers = #tpu.dot_dimension_numbers<[1], [0], [0], [1], [0, 0, 1, 1], [], []>} : vector<12x16xbf16>, vector<16x16xbf16>, vector<12x16xf32> -> vector<12x16xf32>
    %c504 = arith.constant 504 : index
    %c0_111 = arith.constant 0 : index
    %304 = vector.load %arg4[%c504, %c0_111] : memref<512x32xf32, #tpu.memory_space<vmem>>, vector<1x16xf32>
    %305 = vector.broadcast %304 : vector<1x16xf32> to vector<12x16xf32>
    %306 = arith.addf %303, %305 : vector<12x16xf32>
    %cst_112 = arith.constant 0.000000e+00 : f32
    %307 = vector.broadcast %cst_112 : f32 to vector<48x128xf32>
    %c0_113 = arith.constant 0 : index
    %c0_114 = arith.constant 0 : index
    %308 = vector.load %arg5[%c0_113, %c0_114] : memref<48x128xf32, #tpu.memory_space<vmem>>, vector<48x128xf32>
    tpu.vector_store %arg5[%c0_113, %c0_114], %307 {strides = array<i32>} : memref<48x128xf32, #tpu.memory_space<vmem>>, vector<48x128xf32>,
    %cst_115 = arith.constant 0.000000e+00 : f32
    %309 = vector.broadcast %cst_115 : f32 to vector<12x112xf32>
    %310 = tpu.concatenate %306, %309 in 1 : vector<12x16xf32>, vector<12x112xf32> -> vector<12x128xf32>
    %c0_116 = arith.constant 0 : index
    %c0_117 = arith.constant 0 : index
    %311 = vector.load %arg5[%c0_116, %c0_117] : memref<48x128xf32, #tpu.memory_space<vmem>>, vector<12x128xf32>
    tpu.vector_store %arg5[%c0_116, %c0_117], %310 {strides = array<i32>} : memref<48x128xf32, #tpu.memory_space<vmem>>, vector<12x128xf32>,
    %cst_118 = arith.constant dense<0.000000e+00> : vector<46x16xf32>
    %312 = tpu.matmul %158, %306, %cst_118 {dimension_numbers = #tpu.dot_dimension_numbers<[1], [0], [0], [1], [0, 0, 1, 1], [], []>} : vector<46x12xf32>, vector<12x16xf32>, vector<46x16xf32> -> vector<46x16xf32>
    %313 = vector.extract_strided_slice %312 {offsets = [0, 0], sizes = [23, 16], strides = [1, 1]} : vector<46x16xf32> to vector<23x16xf32>
    %314 = vector.extract_strided_slice %312 {offsets = [23, 0], sizes = [23, 16], strides = [1, 1]} : vector<46x16xf32> to vector<23x16xf32>
    %315 = tpu.concatenate %313, %314 in 1 : vector<23x16xf32>, vector<23x16xf32> -> vector<23x32xf32>
    %cst_119 = arith.constant 0.000000e+00 : f32
    %316 = vector.broadcast %cst_119 : f32 to vector<23x96xf32>
    %317 = tpu.concatenate %315, %316 in 1 : vector<23x32xf32>, vector<23x96xf32> -> vector<23x128xf32>
    %c16 = arith.constant 16 : index
    %c0_120 = arith.constant 0 : index
    %318 = vector.load %arg5[%c16, %c0_120] : memref<48x128xf32, #tpu.memory_space<vmem>>, vector<23x128xf32>
    tpu.vector_store %arg5[%c16, %c0_120], %317 {strides = array<i32>} : memref<48x128xf32, #tpu.memory_space<vmem>>, vector<23x128xf32>,
    %cst_121 = arith.constant dense<0.000000e+00> : vector<16xf32>
    %319 = vector.multi_reduction <add>, %306, %cst_121 [0] : vector<12x16xf32> to vector<16xf32>
    %320 = vector.shape_cast %319 : vector<16xf32> to vector<1x16xf32>
    %cst_122 = arith.constant 1.200000e+01 : f32
    %321 = vector.broadcast %cst_122 : f32 to vector<1x16xf32>
    %322 = arith.divf %320, %321 : vector<1x16xf32>
    %cst_123 = arith.constant 0.000000e+00 : f32
    %323 = vector.broadcast %cst_123 : f32 to vector<1x112xf32>
    %324 = tpu.concatenate %322, %323 in 1 : vector<1x16xf32>, vector<1x112xf32> -> vector<1x128xf32>
    %c40_124 = arith.constant 40 : index
    %c0_125 = arith.constant 0 : index
    %325 = vector.load %arg5[%c40_124, %c0_125] : memref<48x128xf32, #tpu.memory_space<vmem>>, vector<1x128xf32>
    tpu.vector_store %arg5[%c40_124, %c0_125], %324 {strides = array<i32>} : memref<48x128xf32, #tpu.memory_space<vmem>>, vector<1x128xf32>,
    return
  }
}

</mosaic_0001>

<bundles_post_ra>
// kernel: base_gin_forward.1
= control target key start
LH: loop header
LB: loop body
LE: loop exit
PB: predicated region body
PF: predicated region fallthrough
CT: control target
= control target key end

     0   :  { %v1709_v0 = vmov 0.0   ;;  %vm34_vm0 = vcmask 1041408   ;;  %vm1710_vm1 = vmmov 0   ;;  %vm30_vm2 = vcmask 31744   ;;  %s1715_s7 = smov 16   ;;  %s2194_s4 = inlined_call_operand.vmem [shape: f32[512,32], index: 4, kind: input, shape index: {}]   ;;  %s2195_s0 = inlined_call_operand.vmem [shape: f32[8,4], index: 0, kind: input, shape index: {}]   ;;  %s2196_s1 = inlined_call_operand.vmem [shape: f32[4,3], index: 1, kind: input, shape index: {}]   ;;  %s2197_s2 = inlined_call_operand.vmem [shape: s32[46,1], index: 2, kind: input, shape index: {}]   ;;  %s2198_s3 = inlined_call_operand.vmem [shape: s32[1,23], index: 3, kind: input, shape index: {}]   ;;  %s2199_s5 = inlined_call_operand.vmem [shape: f32[48,128], index: 5, kind: output, shape index: {}]  }
   0x1   :  { %1548 = vmatprep.subr.bf16.mxu0 %v1709_v0  ;;  %v22_v1 = vld [vmem:[%s2194_s4] sm:$0xf]  ;;  %1554 = vmatprep.subr.bf16.mxu1 %v1709_v0  ;;  %v117_v6 = vld [vmem:[%s2194_s4 + $0x8] sm:$0xff]  ;;  %v118_v7 = vld [vmem:[%s2194_s4 + $0x10] sm:$0xff]  ;;  %vm80_vm3 = vcmask 261120   ;;  %v104_v39 = vlaneseq  ;;  %vm278_vm4 = vcmask 1040384  }
   0x2   :  { %v23_v2 = vpack.c.bf16 %v22_v1, %v22_v1  ;;  %1550 = vmatprep.mubr.msk.bf16.mxu0 %vm1710_vm1, %v1709_v0  ;;  %v21_v3 = vld [vmem:[%s2195_s0] sm:$0xff]  ;;  %1558 = vmatprep.mubr.msk.bf16.mxu1 %vm1710_vm1, %v1709_v0  ;;  %v121_v8 = vpack.c.bf16 %v118_v7, %v117_v6  ;;  %v119_v9 = vld [vmem:[%s2194_s4 + $0x18] sm:$0xff]  ;;  %v1447_v12 = vld [vmem:[%s2194_s4 + $0x130] ss:$0 sm:$0xff]  ;;  %v1711_v50 = vmov 65535   ;;  %vm274_vm5 = vcmask 23552  }
   0x3   :  { %v24_v5 = vpack.c.bf16 %v21_v3, %v21_v3  ;;  %v120_v10 = vld [vmem:[%s2194_s4 + $0x20] sm:$0xff]  ;;  %v1782_v40 = vshrl.u32 %v104_v39, 7  ;;  %v78_v41 = vld [vmem:[%s2194_s4 + $0x138] sm:$0x1]  ;;  %v266_v48 = vld [vmem:[%s2194_s4 + $0x48] sm:$0x7] }
   0x4   :  { %v36_v4 = vsel %vm34_vm0, %v23_v2, 0  ;;  %1555 = vmatpush3.bf16.msra.mxu1 %v121_v8  ;;  %v122_v11 = vpack.c.bf16 %v120_v10, %v119_v9  ;;  %v79_v45 = vld [vmem:[%s2194_s4 + $0x140] sm:$0x1]  ;;  %v279_v51 = vsel %vm278_vm4, 4294967295, %v1711_v50  ;;  %v267_v54 = vpack.c.bf16 %v266_v48, %v266_v48  ;;  %v210_v62 = vld [vmem:[%s2194_s4 + $0x28] sm:$0xff]  ;;  %v211_v63 = vld [vmem:[%s2194_s4 + $0x30] sm:$0xff] }
   0x5   :  { %1549 = vmatpush3.bf16.msra.mxu0 %v36_v4  ;;  %1556 = vmatprep.subr.bf16.mxu1 %v1709_v0  ;;  %v1788_v42 = vsub.s32 0, %v1782_v40  ;;  %v280_v55 = vsel %vm34_vm0, %v279_v51, 0  ;;  %v265_v60 = vld [vmem:[%s2196_s1] sm:$0xf]  ;;  %v214_v1 = vpack.c.bf16 %v211_v63, %v210_v62  ;;  %v212_v2 = vld [vmem:[%s2194_s4 + $0x38] sm:$0xff]  ;;  %v513_v7 = vld [vmem:[%s2197_s2 + $0x10] sm:$0xff] }
   0x6   :  { %1562 = vmatprep.subr.bf16.mxu0 %v1709_v0  ;;  %v282_v58 = vand.u32 %v280_v55, %v267_v54  ;;  %v268_v61 = vpack.c.bf16 %v265_v60, %v265_v60  ;;  %v213_v3 = vld [vmem:[%s2194_s4 + $0x40] sm:$0xff]  ;;  %v512_v8 = vld [vmem:[%s2197_s2 + $0x8] sm:$0xff]  ;;  %v514_v9 = vld [vmem:[%s2197_s2 + $0x18] sm:$0xff]  ;;  %vm326_vm6 = vcmask 257024   ;;  %vm582_vm11 = vcmask 1046528   ;;  %1277 = vst [vmem:[%s2199_s5 + $0x8] sm:$0xff] %v1709_v0 }
   0x7   :  { %v215_v4 = vpack.c.bf16 %v213_v3, %v212_v2  ;;  %v511_v6 = vld [vmem:[%s2197_s2] sm:$0xff]  ;;  %vm575_vm14 = vcmask 187392   ;;  %1280 = vst [vmem:[%s2199_s5 + $0x20] sm:$0xff] %v1709_v0  ;;  %1281 = vst [vmem:[%s2199_s5 + $0x28] sm:$0xff] %v1709_v0 }
   0x8   :  { %1551 = vmatmul.mubr.msk.bf16.vlgmr.msra.gmra.mrb[0].mxu0 %vm30_vm2, %v24_v5  ;;  %1557 = vmatpush3.bf16.msra.mxu1 %v122_v11  ;;  %v1712_v5 = vmov 0   ;;  %v515_v10 = vld [vmem:[%s2197_s2 + $0x20] sm:$0xff]  ;;  %v516_v11 = vld [vmem:[%s2197_s2 + $0x28] sm:$0x3f]  ;;  %vm667_vm2 = vcmask 1045504  }
   0x9   :  { %1566 = vmatprep.mubr.msk.bf16.mxu0 %vm1710_vm1, %v1709_v0  ;;  %1570 = vmatprep.subr.bf16.mxu1 %v1709_v0 }
   0xa   :  { %1563 = vmatpush3.bf16.msra.mxu0 %v214_v1  ;;  %1693 = vset.pattern.permute.xlu0 %v1712_v5 }
   0xb   :  { %1564 = vmatprep.subr.bf16.mxu0 %v1709_v0  ;;  %1694 = vset.pattern.permute.xlu1 %v1712_v5 }
   0xc   :  { %520 = vperm.xlu0 %1693, %v511_v6   ;;  %526 = vperm.xlu1 %1694, %v513_v7   ;;  %v172_v6 = vld [vmem:[%s2194_s4 + $0x150] sm:$0x1] }
   0xe   :  { %1565 = vmatpush3.bf16.msra.mxu0 %v215_v4 }
   0xf   :  { %1576 = vmatprep.subr.bf16.mxu0 %v1709_v0 }
  0x10   :  { %523 = vperm.xlu0 %1693, %v512_v8   ;;  %529 = vperm.xlu1 %1694, %v514_v9   ;;  %v173_v9 = vld [vmem:[%s2194_s4 + $0x158] sm:$0x1] }
  0x14   :  { %532 = vperm.xlu0 %1693, %v515_v10   ;;  %535 = vperm.xlu1 %1694, %v516_v11  }
  0xdb   :  { %v72_v13 = vpop.f32.mrb[0].mxu0 }
  0xdc   :  { %v73_v14 = vadd.f32 %v1447_v12, %v72_v13  ;;  %v1552_v15 = vpop.f32.mrb[1].mxu0  ;;  %v1449_v12 = vld [vmem:[%s2194_s4 + $0x148] ss:$0 sm:$0xff] }
  0xdd   :  { %v75_v16 = vpop.f32.mrb[2].mxu0 }
  0xde   :  { %v81_v17 = vsel %vm80_vm3, %v73_v14, 0.0  ;;  %v89_v18 = vmul.f32 %v73_v14, %v73_v14  ;;  %v1553_v19 = vpop.f32.mrb[3].mxu0 }
  0xdf   :  { %v82_v20 = vrot.slane %v81_v17, 4 }
  0xe0   :  { %v90_v21 = vsel %vm80_vm3, %v89_v18, 0.0 }
  0xe1   :  { %v83_v22 = vadd.f32 %v82_v20, %v81_v17  ;;  %v91_v23 = vrot.slane %v90_v21, 4 }
  0xe3   :  { %v84_v24 = vrot.slane %v83_v22, 2  ;;  %v92_v25 = vadd.f32 %v91_v23, %v90_v21 }
  0xe5   :  { %v85_v26 = vadd.f32 %v84_v24, %v83_v22  ;;  %v93_v27 = vrot.slane %v92_v25, 2  ;;  %v1453_v24 = vld [vmem:[%s2194_s4 + $0x168] ss:$0 sm:$0xff] }
  0xe7   :  { %v86_v28 = vrot.slane %v85_v26, 1  ;;  %v94_v29 = vadd.f32 %v93_v27, %v92_v25 }
  0xe9   :  { %v87_v30 = vadd.f32 %v86_v28, %v85_v26  ;;  %v95_v31 = vrot.slane %v94_v29, 1 }
  0xeb   :  { %v88_v32 = vmul.f32 0.125, %v87_v30  ;;  %v96_v33 = vadd.f32 %v95_v31, %v94_v29 }
  0xed   :  { %v97_v34 = vmul.f32 0.125, %v96_v33  ;;  %v98_v35 = vmul.f32 %v88_v32, %v88_v32 }
  0xef   :  { %v99_v36 = vsub.f32 %v97_v34, %v98_v35 }
  0xf1   :  { %v100_v37 = vmax.f32 %v99_v36, 0.0 }
  0xf3   :  { %v101_v38 = vadd.f32 1e-05, %v100_v37 }
  0xf5   :  { %1695 = vrsqrt.f32 %v101_v38 }
  0xff   :  { %v1696_v43 = vpop.eup %1695 }
 0x100   :  { %v103_v44 = vmul.f32 %v1696_v43, %v78_v41 }
 0x102   :  { %v107_v46 = vrot.slane %v103_v44, %v1788_v42  ;;  %v109_v47 = vmul.f32 %v103_v44, %v88_v32 }
 0x104   :  { %v110_v49 = vsub.f32 %v79_v45, %v109_v47  ;;  %v108_v52 = vmul.f32 %v107_v46, %v73_v14 }
 0x106   :  { %v114_v53 = vrot.slane %v110_v49, %v1788_v42 }
 0x108   :  { %v115_v56 = vadd.f32 %v114_v53, %v108_v52 }
 0x10a   :  { %v116_v57 = vmax.f32 %v115_v56, 0.0 }
 0x10c   :  { %v123_v59 = vpack.c.bf16 %v116_v57, %v116_v57 }
 0x10e   :  { %1559 = vmatmul.mubr.msk.bf16.vlgmr.msra.gmra.mrb[0].mxu1 %vm80_vm3, %v123_v59 }
 0x10f   :  { %1571 = vmatpush3.bf16.msra.mxu1 %v282_v58  ;;  %1572 = vmatprep.mubr.msk.bf16.mxu1 %vm1710_vm1, %v1709_v0 }
 0x110   :  { %1584 = vmatprep.subr.bf16.mxu1 %v1709_v0 }
 0x116   :  { %1573 = vmatmul.mubr.msk.bf16.vlgmr.msra.gmra.mrb[4].mxu1 %vm274_vm5, %v268_v61  ;;  %vm663_vm5 = vcmask 97280  }
 0x117   :  { %1588 = vmatprep.mubr.msk.bf16.mxu1 %vm1710_vm1, %v1709_v0 }
 0x1e1   :  { %v166_v13 = vpop.f32.mrb[0].mxu1 }
 0x1e2   :  { %v1844_v14 = vadd.f32 %v1449_v12, %v166_v13  ;;  %v1560_v15 = vpop.f32.mrb[1].mxu1  ;;  %v324_v13 = vld [vmem:[%s2194_s4 + $0x170] sm:$0x1] }
 0x1e3   :  { %v169_v16 = vpop.f32.mrb[2].mxu1 }
 0x1e4   :  { %v174_v17 = vsel %vm80_vm3, %v1844_v14, 0.0  ;;  %v182_v18 = vmul.f32 %v1844_v14, %v1844_v14  ;;  %v1561_v19 = vpop.f32.mrb[3].mxu1 }
 0x1e5   :  { %v175_v20 = vrot.slane %v174_v17, 4 }
 0x1e6   :  { %v183_v21 = vsel %vm80_vm3, %v182_v18, 0.0 }
 0x1e7   :  { %v176_v22 = vadd.f32 %v175_v20, %v174_v17  ;;  %v184_v23 = vrot.slane %v183_v21, 4  ;;  %v363_v20 = vld [vmem:[%s2194_s4 + $0x50] sm:$0xff] }
 0x1e9   :  { %v177_v25 = vrot.slane %v176_v22, 2  ;;  %v185_v26 = vadd.f32 %v184_v23, %v183_v21  ;;  %v318_v27 = vpop.f32.mrb[4].mxu1  ;;  %v364_v21 = vld [vmem:[%s2194_s4 + $0x58] sm:$0xff] }
 0x1ea   :  { %v1854_v28 = vadd.f32 %v1453_v24, %v318_v27  ;;  %v1574_v29 = vpop.f32.mrb[5].mxu1 }
 0x1eb   :  { %v178_v30 = vadd.f32 %v177_v25, %v176_v22  ;;  %v186_v31 = vrot.slane %v185_v26, 2  ;;  %v321_v32 = vpop.f32.mrb[6].mxu1  ;;  %v325_v22 = vld [vmem:[%s2194_s4 + $0x178] sm:$0x1]  ;;  %v367_v25 = vpack.c.bf16 %v364_v21, %v363_v20  ;;  %v365_v29 = vld [vmem:[%s2194_s4 + $0x60] sm:$0xff] }
 0x1ec   :  { %v327_v33 = vsel %vm326_vm6, %v1854_v28, 0.0  ;;  %v335_v34 = vmul.f32 %v1854_v28, %v1854_v28  ;;  %v1575_v35 = vpop.f32.mrb[7].mxu1 }
 0x1ed   :  { %v179_v36 = vrot.slane %v178_v30, 1  ;;  %v187_v37 = vadd.f32 %v186_v31, %v185_v26  ;;  %v328_v38 = vrot.slane %v327_v33, 4 }
 0x1ee   :  { %v336_v41 = vsel %vm326_vm6, %v335_v34, 0.0 }
 0x1ef   :  { %v180_v43 = vadd.f32 %v179_v36, %v178_v30  ;;  %v188_v44 = vrot.slane %v187_v37, 1  ;;  %v329_v45 = vadd.f32 %v328_v38, %v327_v33  ;;  %v337_v46 = vrot.slane %v336_v41, 4  ;;  %v366_v30 = vld [vmem:[%s2194_s4 + $0x68] sm:$0xff] }
 0x1f0   :  { %v368_v33 = vpack.c.bf16 %v366_v30, %v365_v29 }
 0x1f1   :  { %v181_v47 = vmul.f32 0.125, %v180_v43  ;;  %v189_v48 = vadd.f32 %v188_v44, %v187_v37  ;;  %v330_v49 = vrot.slane %v329_v45, 2  ;;  %v338_v50 = vadd.f32 %v337_v46, %v336_v41  ;;  %v1896_v37 = vpop.permute.xlu0 %520  ;;  %v456_v41 = vld [vmem:[%s2194_s4 + $0x70] sm:$0xff]  ;;  %v457_v43 = vld [vmem:[%s2194_s4 + $0x78] sm:$0xff]  ;;  %v459_v46 = vld [vmem:[%s2194_s4 + $0x88] sm:$0xff] }
 0x1f2   :  { %v1713_v44 = vmov 1.0|1.0  }
 0x1f3   :  { %v190_v51 = vmul.f32 0.125, %v189_v48  ;;  %v191_v52 = vmul.f32 %v181_v47, %v181_v47  ;;  %v331_v53 = vadd.f32 %v330_v49, %v329_v45  ;;  %v339_v54 = vrot.slane %v338_v50, 2  ;;  %v458_v45 = vld [vmem:[%s2194_s4 + $0x80] sm:$0xff]  ;;  %v527_v48 = vpop.permute.xlu1 %526 }
 0x1f4   :  { %v1465_v49 = vld [vmem:[%s2198_s3] ss:$0 sm:$0xff] }
 0x1f5   :  { %v192_v55 = vsub.f32 %v190_v51, %v191_v52  ;;  %v332_v56 = vrot.slane %v331_v53, 1  ;;  %v340_v57 = vadd.f32 %v339_v54, %v338_v50  ;;  %v1901_v38 = vpop.permute.xlu0 %523  ;;  %v1931_v50 = vadd.s32 8, %v1782_v40 }
 0x1f6   :  { %vm563_vm12 = vcmp.eq.s32.totalorder %v1465_v49, %v1782_v40 }
 0x1f7   :  { %v193_v58 = vmax.f32 %v192_v55, 0.0  ;;  %v333_v59 = vadd.f32 %v332_v56, %v331_v53  ;;  %v341_v60 = vrot.slane %v340_v57, 1  ;;  %vm564_vm13 = vcmp.eq.s32.totalorder %v1465_v49, %v1931_v50 }
 0x1f8   :  { %v1466_v52 = vsel %vm563_vm12, 1.0, %v1709_v0  ;;  %v1467_v53 = vsel %vm564_vm13, 1.0, %v1709_v0 }
 0x1f9   :  { %v194_v61 = vadd.f32 1e-05, %v193_v58  ;;  %v334_v62 = vmul.f32 0.25, %v333_v59  ;;  %v342_v63 = vadd.f32 %v341_v60, %v340_v57  ;;  %v1455_v58 = vld [vmem:[%s2194_s4 + $0x180] ss:$0 sm:$0xff] }
 0x1fb   :  { %1697 = vrsqrt.f32 %v194_v61  ;;  %v343_v1 = vmul.f32 0.25, %v342_v63  ;;  %v344_v2 = vmul.f32 %v334_v62, %v334_v62 }
 0x1fd   :  { %v345_v3 = vsub.f32 %v343_v1, %v344_v2 }
 0x1ff   :  { %v346_v4 = vmax.f32 %v345_v3, 0.0 }
 0x201   :  { %v347_v5 = vadd.f32 1e-05, %v346_v4 }
 0x203   :  { %1699 = vrsqrt.f32 %v347_v5 }
 0x205   :  { %v1698_v7 = vpop.eup %1697 }
 0x206   :  { %v196_v8 = vmul.f32 %v1698_v7, %v172_v6 }
 0x208   :  { %v200_v10 = vrot.slane %v196_v8, %v1788_v42  ;;  %v202_v11 = vmul.f32 %v196_v8, %v181_v47  ;;  %v461_v47 = vpack.c.bf16 %v459_v46, %v458_v45  ;;  %v1451_v46 = vld [vmem:[%s2194_s4 + $0x160] ss:$0 sm:$0xff] }
 0x20a   :  { %v203_v12 = vsub.f32 %v173_v9, %v202_v11  ;;  %v201_v15 = vmul.f32 %v200_v10, %v1844_v14 }
 0x20c   :  { %v207_v16 = vrot.slane %v203_v12, %v1788_v42 }
 0x20d   :  { %v1700_v17 = vpop.eup %1699 }
 0x20e   :  { %v208_v18 = vadd.f32 %v207_v16, %v201_v15  ;;  %v349_v19 = vmul.f32 %v1700_v17, %v324_v13 }
 0x210   :  { %v209_v23 = vmax.f32 %v208_v18, 0.0  ;;  %v353_v14 = vrot.slane %v349_v19, %v1788_v42  ;;  %v355_v24 = vmul.f32 %v349_v19, %v334_v62 }
 0x212   :  { %v216_v26 = vpack.c.bf16 %v209_v23, %v209_v23  ;;  %v356_v27 = vsub.f32 %v325_v22, %v355_v24  ;;  %v354_v31 = vmul.f32 %v353_v14, %v1854_v28  ;;  %v1899_v28 = vand.u32 127, %v104_v39  ;;  %v418_v23 = vld [vmem:[%s2194_s4 + $0x188] sm:$0x1] }
 0x213   :  { %v460_v39 = vpack.c.bf16 %v457_v43, %v456_v41 }
 0x214   :  { %v360_v32 = vrot.slane %v356_v27, %v1788_v42  ;;  %1567 = vmatmul.mubr.msk.bf16.vlgmr.msra.gmra.mrb[4].mxu0 %vm80_vm3, %v216_v26  ;;  %vm537_vm7 = vcmp.eq.s32.totalorder %v1896_v37, %v1899_v28  ;;  %vm538_vm8 = vcmp.eq.s32.totalorder %v1901_v38, %v1899_v28  ;;  %vm539_vm10 = vcmp.eq.s32.totalorder %v527_v48, %v1899_v28  ;;  %v1486_v37 = vld [vmem:[%s2194_s4 + $0x1e0] ss:$0 sm:$0xff] }
 0x215   :  { %1577 = vmatpush3.bf16.msra.mxu0 %v367_v25  ;;  %1580 = vmatprep.mubr.msk.bf16.mxu0 %vm1710_vm1, %v1709_v0  ;;  %vm1676_vm9 = vmpackc.low %vm538_vm8, %vm537_vm7  ;;  %v1935_v51 = vsel %vm539_vm10, 1.0, %v1709_v0  ;;  %v419_v25 = vld [vmem:[%s2194_s4 + $0x190] sm:$0x1]  ;;  %vm570_vm15 = vcmp.eq.s32.totalorder %v1931_v50, %v1899_v28  ;;  %vm569_vm0 = vcmp.eq.s32.totalorder %v1782_v40, %v1899_v28 }
 0x216   :  { %v361_v34 = vadd.f32 %v360_v32, %v354_v31  ;;  %1578 = vmatprep.subr.bf16.mxu0 %v1709_v0  ;;  %1585 = vmatpush3.bf16.msra.mxu1 %v460_v39  ;;  %v1468_v41 = vsel %vm569_vm0, 1.0, %v1709_v0 }
 0x217   :  { %1586 = vmatprep.subr.bf16.mxu1 %v1709_v0 }
 0x218   :  { %v362_v35 = vmax.f32 %v361_v34, 0.0 }
 0x219   :  { %1579 = vmatpush3.bf16.msra.mxu0 %v368_v33 }
 0x21a   :  { %v369_v36 = vpack.c.bf16 %v362_v35, %v362_v35  ;;  %1677 = vmatprep.subr.msk.bf16.mxu0 %vm1676_vm9, %v1713_v44  ;;  %1587 = vmatpush3.bf16.msra.mxu1 %v461_v47  ;;  %v1469_v35 = vsel %vm570_vm15, 1.0, %v1709_v0  ;;  %v1457_v47 = vld [vmem:[%s2194_s4 + $0x198] ss:$0 sm:$0xff] }
 0x21b   :  { %1607 = vmatprep.subr.bf16.mxu1 %v1709_v0 }
 0x21c   :  { %1581 = vmatmul.mubr.msk.bf16.vlgmr.msra.gmra.mrb[8].mxu0 %vm80_vm3, %v369_v36 }
 0x21d   :  { %1679 = vmatpush3.bf16.msk.msra.mxu0 %vm1676_vm9, %v1713_v44  ;;  %1598 = vmatprep.mubr.msk.f32.mxu0 %vm575_vm14, %v1466_v52  ;;  %vm721_vm9 = vcmask 130048  }
 0x21e   :  { %1596 = vmatprep.subr.msk.mxu0 %vm582_vm11, %v1935_v51 }
 0x221   :  { %1597 = vmatpush3.msk.msra.mxu0 %vm582_vm11, %v1935_v51 }
 0x222   :  { %1601 = vmatprep.subr.bf16.mxu0 %v1709_v0 }
 0x224   :  { %1599 = vmatmul.mubr.msk.f32.vlgmr.msra.gmra.mrb[12].mxu0 %vm575_vm14, %v1467_v53 }
 0x225   :  { %1603 = vmatprep.mubr.msk.bf16.mxu0 %vm1710_vm1, %v1709_v0 }
 0x2e7   :  { %v259_v54 = vpop.f32.mrb[4].mxu0 }
 0x2e8   :  { %v1568_v55 = vpop.f32.mrb[5].mxu0  ;;  %v260_v40 = vadd.f32 %v1451_v46, %v259_v54  ;;  %v712_v54 = vld [vmem:[%s2194_s4 + $0x90] sm:$0xff]  ;;  %v766_v46 = vld [vmem:[%s2194_s4 + $0x1a8] sm:$0x1] }
 0x2e9   :  { %v262_v56 = vpop.f32.mrb[6].mxu0 }
 0x2ea   :  { %v1569_v57 = vpop.f32.mrb[7].mxu0 }
 0x2eb   :  { %v713_v57 = vld [vmem:[%s2194_s4 + $0x98] sm:$0xff] }
 0x2ef   :  { %v412_v59 = vpop.f32.mrb[8].mxu0 }
 0x2f0   :  { %v413_v60 = vadd.f32 %v1455_v58, %v412_v59  ;;  %v1582_v61 = vpop.f32.mrb[9].mxu0  ;;  %v714_v58 = vpack.c.bf16 %v713_v57, %v712_v54 }
 0x2f1   :  { %v415_v62 = vpop.f32.mrb[10].mxu0 }
 0x2f2   :  { %v420_v63 = vsel %vm326_vm6, %v413_v60, 0.0  ;;  %v428_v1 = vmul.f32 %v413_v60, %v413_v60  ;;  %v1583_v2 = vpop.f32.mrb[11].mxu0 }
 0x2f3   :  { %v421_v3 = vrot.slane %v420_v63, 4  ;;  %v813_v2 = vld [vmem:[%s2194_s4 + $0xa8] sm:$0xff] }
 0x2f4   :  { %v429_v4 = vsel %vm326_vm6, %v428_v1, 0.0  ;;  %v812_v1 = vld [vmem:[%s2194_s4 + $0xa0] sm:$0xff] }
 0x2f5   :  { %v422_v5 = vadd.f32 %v421_v3, %v420_v63  ;;  %v430_v6 = vrot.slane %v429_v4, 4  ;;  %v816_v3 = vpack.c.bf16 %v813_v2, %v812_v1  ;;  %v1478_v1 = vld [vmem:[%s2194_s4 + $0x1b8] ss:$0 sm:$0xff] }
 0x2f7   :  { %v423_v7 = vrot.slane %v422_v5, 2  ;;  %v431_v8 = vadd.f32 %v430_v6, %v429_v4  ;;  %v1600_v36 = vpop.f32.mrb[12].mxu0  ;;  %v814_v4 = vld [vmem:[%s2194_s4 + $0xb0] sm:$0xff] }
 0x2f8   :  { %v658_v43 = vadd.f32 %v1600_v36, %v1469_v35  ;;  %v652_v39 = vpop.f32.mrb[13].mxu0 }
 0x2f9   :  { %v424_v9 = vadd.f32 %v423_v7, %v422_v5  ;;  %v432_v10 = vrot.slane %v431_v8, 2  ;;  %v653_v44 = vadd.f32 %v1468_v41, %v652_v39  ;;  %v815_v5 = vld [vmem:[%s2194_s4 + $0xb8] sm:$0xff]  ;;  %v1476_v7 = vld [vmem:[%s2194_s4 + $0x1a0] ss:$0 sm:$0xff] }
 0x2fa   :  { %v817_v6 = vpack.c.bf16 %v815_v5, %v814_v4 }
 0x2fb   :  { %v425_v11 = vrot.slane %v424_v9, 1  ;;  %v433_v12 = vadd.f32 %v432_v10, %v431_v8  ;;  %v1968_v45 = vpack.c.bf16 %v658_v43, %v653_v44 }
 0x2fd   :  { %v426_v13 = vadd.f32 %v425_v11, %v424_v9  ;;  %v434_v15 = vrot.slane %v433_v12, 1 }
 0x2ff   :  { %v427_v16 = vmul.f32 0.25, %v426_v13  ;;  %v435_v17 = vadd.f32 %v434_v15, %v433_v12 }
 0x301   :  { %v436_v18 = vmul.f32 0.25, %v435_v17  ;;  %v437_v19 = vmul.f32 %v427_v16, %v427_v16 }
 0x303   :  { %v438_v20 = vsub.f32 %v436_v18, %v437_v19 }
 0x305   :  { %v439_v21 = vmax.f32 %v438_v20, 0.0 }
 0x307   :  { %v440_v22 = vadd.f32 1e-05, %v439_v21 }
 0x309   :  { %1701 = vrsqrt.f32 %v440_v22 }
 0x313   :  { %v1702_v14 = vpop.eup %1701 }
 0x314   :  { %v442_v24 = vmul.f32 %v1702_v14, %v418_v23 }
 0x316   :  { %v446_v26 = vrot.slane %v442_v24, %v1788_v42  ;;  %v448_v27 = vmul.f32 %v442_v24, %v427_v16 }
 0x318   :  { %v449_v29 = vsub.f32 %v419_v25, %v448_v27  ;;  %v447_v30 = vmul.f32 %v446_v26, %v413_v60 }
 0x31a   :  { %v453_v31 = vrot.slane %v449_v29, %v1788_v42 }
 0x31c   :  { %v454_v32 = vadd.f32 %v453_v31, %v447_v30 }
 0x31e   :  { %v455_v33 = vmax.f32 %v454_v32, 0.0 }
 0x320   :  { %v462_v34 = vpack.c.bf16 %v455_v33, %v455_v33 }
 0x322   :  { %1589 = vmatmul.mubr.msk.bf16.vlgmr.msra.gmra.mrb[8].mxu1 %vm80_vm3, %v462_v34 }
 0x323   :  { %1609 = vmatprep.mubr.msk.bf16.mxu1 %vm1710_vm1, %v1709_v0  ;;  %1608 = vmatpush3.bf16.msra.mxu1 %v714_v58 }
 0x324   :  { %1621 = vmatprep.subr.bf16.mxu1 %v1709_v0 }
 0x3f5   :  { %v505_v48 = vpop.f32.mrb[8].mxu1 }
 0x3f6   :  { %v506_v49 = vadd.f32 %v1457_v47, %v505_v48  ;;  %v1590_v50 = vpop.f32.mrb[9].mxu1 }
 0x3f7   :  { %v508_v52 = vpop.f32.mrb[10].mxu1 }
 0x3f8   :  { %v662_v53 = vpack.c.bf16 %v506_v49, %v260_v40  ;;  %v1591_v55 = vpop.f32.mrb[11].mxu1  ;;  %v767_v40 = vld [vmem:[%s2194_s4 + $0x1b0] sm:$0x1] }
 0x3fa   :  { %v669_v56 = vsel %vm667_vm2, %v662_v53, 0 }
 0x3fb   :  { %1602 = vmatpush3.bf16.msra.mxu0 %v669_v56 }
 0x3fc   :  { %1613 = vmatprep.subr.bf16.mxu0 %v1709_v0 }
 0x3fe   :  { %1604 = vmatmul.mubr.msk.bf16.vlgmr.msra.gmra.mrb[16].mxu0 %vm663_vm5, %v1968_v45 }
 0x3ff   :  { %1617 = vmatprep.mubr.msk.bf16.mxu0 %vm1710_vm1, %v1709_v0  ;;  %1614 = vmatpush3.bf16.msra.mxu0 %v816_v3 }
 0x400   :  { %1615 = vmatprep.subr.bf16.mxu0 %v1709_v0 }
 0x403   :  { %1616 = vmatpush3.bf16.msra.mxu0 %v817_v6 }
 0x404   :  { %1627 = vmatprep.subr.bf16.mxu0 %v1709_v0 }
 0x4d1   :  { %v705_v59 = vpop.f32.mrb[16].mxu0 }
 0x4d2   :  { %v1605_v60 = vpop.f32.mrb[17].mxu0 }
 0x4d3   :  { %v708_v61 = vpop.f32.mrb[18].mxu0 }
 0x4d4   :  { %v715_v62 = vpack.c.bf16 %v708_v61, %v705_v59  ;;  %v1606_v63 = vpop.f32.mrb[19].mxu0  ;;  %v915_v61 = vld [vmem:[%s2194_s4 + $0xc0] sm:$0xff] }
 0x4d6   :  { %1610 = vmatmul.mubr.msk.bf16.vlgmr.msra.gmra.mrb[12].mxu1 %vm721_vm9, %v715_v62  ;;  %v916_v62 = vld [vmem:[%s2194_s4 + $0xc8] sm:$0xff] }
 0x4d7   :  { %1623 = vmatprep.mubr.msk.bf16.mxu1 %vm1710_vm1, %v1709_v0  ;;  %v919_v63 = vpack.c.bf16 %v916_v62, %v915_v61 }
 0x5a9   :  { %v759_v8 = vpop.f32.mrb[12].mxu1 }
 0x5aa   :  { %v760_v9 = vadd.f32 %v1476_v7, %v759_v8  ;;  %v1611_v10 = vpop.f32.mrb[13].mxu1 }
 0x5ab   :  { %v762_v11 = vpop.f32.mrb[14].mxu1 }
 0x5ac   :  { %v778_v12 = vmul.f32 %v760_v9, %v760_v9  ;;  %v763_v13 = vadd.f32 %v1476_v7, %v762_v11  ;;  %v1612_v15 = vpop.f32.mrb[15].mxu1  ;;  %v768_v16 = vsel %vm80_vm3, %v760_v9, 0.0 }
 0x5ae   :  { %v769_v17 = vsel %vm326_vm6, %v763_v13, 0.0  ;;  %v779_v18 = vmul.f32 %v763_v13, %v763_v13  ;;  %v780_v20 = vsel %vm80_vm3, %v778_v12, 0.0  ;;  %v917_v12 = vld [vmem:[%s2194_s4 + $0xd0] sm:$0xff] }
 0x5af   :  { %v770_v19 = vadd.f32 %v769_v17, %v768_v16 }
 0x5b0   :  { %v781_v21 = vsel %vm326_vm6, %v779_v18, 0.0 }
 0x5b1   :  { %v771_v22 = vrot.slane %v770_v19, 4  ;;  %v782_v23 = vadd.f32 %v781_v21, %v780_v20  ;;  %v1017_v21 = vld [vmem:[%s2194_s4 + $0xe0] sm:$0xff] }
 0x5b3   :  { %v772_v14 = vadd.f32 %v771_v22, %v770_v19  ;;  %v783_v24 = vrot.slane %v782_v23, 4  ;;  %v1018_v22 = vld [vmem:[%s2194_s4 + $0xe8] sm:$0xff] }
 0x5b5   :  { %v773_v25 = vrot.slane %v772_v14, 2  ;;  %v784_v26 = vadd.f32 %v783_v24, %v782_v23  ;;  %v1021_v23 = vpack.c.bf16 %v1018_v22, %v1017_v21  ;;  %v1020_v24 = vld [vmem:[%s2194_s4 + $0xf8] sm:$0xff] }
 0x5b6   :  { %v1483_v21 = vld [vmem:[%s2194_s4 + $0x1d8] ss:$0 sm:$0xff] }
 0x5b7   :  { %v774_v27 = vadd.f32 %v773_v25, %v772_v14  ;;  %v785_v29 = vrot.slane %v784_v26, 2  ;;  %v1019_v14 = vld [vmem:[%s2194_s4 + $0xf0] sm:$0xff] }
 0x5b8   :  { %v1022_v25 = vpack.c.bf16 %v1020_v24, %v1019_v14 }
 0x5b9   :  { %v775_v30 = vrot.slane %v774_v27, 1  ;;  %v786_v31 = vadd.f32 %v785_v29, %v784_v26  ;;  %v1481_v26 = vld [vmem:[%s2194_s4 + $0x1c0] ss:$0 sm:$0xff] }
 0x5bb   :  { %v776_v32 = vadd.f32 %v775_v30, %v774_v27  ;;  %v787_v33 = vrot.slane %v786_v31, 1 }
 0x5bd   :  { %v777_v34 = vmul.f32 0.083333336, %v776_v32  ;;  %v788_v35 = vadd.f32 %v787_v33, %v786_v31 }
 0x5bf   :  { %v789_v36 = vmul.f32 0.083333336, %v788_v35  ;;  %v790_v41 = vmul.f32 %v777_v34, %v777_v34 }
 0x5c1   :  { %v791_v43 = vsub.f32 %v789_v36, %v790_v41 }
 0x5c3   :  { %v792_v39 = vmax.f32 %v791_v43, 0.0 }
 0x5c5   :  { %v793_v44 = vadd.f32 1e-05, %v792_v39 }
 0x5c7   :  { %1703 = vrsqrt.f32 %v793_v44 }
 0x5d1   :  { %v1704_v47 = vpop.eup %1703 }
 0x5d2   :  { %v795_v48 = vmul.f32 %v1704_v47, %v766_v46 }
 0x5d4   :  { %v799_v49 = vrot.slane %v795_v48, %v1788_v42  ;;  %v802_v50 = vmul.f32 %v795_v48, %v777_v34 }
 0x5d6   :  { %v800_v52 = vmul.f32 %v799_v49, %v760_v9  ;;  %v801_v53 = vmul.f32 %v799_v49, %v763_v13  ;;  %v803_v55 = vsub.f32 %v767_v40, %v802_v50  ;;  %v918_v13 = vld [vmem:[%s2194_s4 + $0xd8] sm:$0xff] }
 0x5d7   :  { %v920_v15 = vpack.c.bf16 %v918_v13, %v917_v12 }
 0x5d8   :  { %v807_v56 = vrot.slane %v803_v55, %v1788_v42 }
 0x5da   :  { %v808_v54 = vadd.f32 %v807_v56, %v800_v52  ;;  %v809_v57 = vadd.f32 %v807_v56, %v801_v53 }
 0x5dc   :  { %v810_v58 = vmax.f32 %v808_v54, 0.0  ;;  %v811_v59 = vmax.f32 %v809_v57, 0.0 }
 0x5de   :  { %v818_v60 = vpack.c.bf16 %v811_v59, %v810_v58 }
 0x5e0   :  { %1618 = vmatmul.mubr.msk.bf16.vlgmr.msra.gmra.mrb[20].mxu0 %vm80_vm3, %v818_v60 }
 0x5e1   :  { %1631 = vmatprep.mubr.msk.bf16.mxu0 %vm1710_vm1, %v1709_v0  ;;  %1628 = vmatpush3.bf16.msra.mxu0 %v919_v63 }
 0x5e2   :  { %1629 = vmatprep.subr.bf16.mxu0 %v1709_v0 }
 0x5e5   :  { %1630 = vmatpush3.bf16.msra.mxu0 %v920_v15 }
 0x5e6   :  { %1643 = vmatprep.subr.bf16.mxu0 %v1709_v0 }
 0x6b3   :  { %v861_v2 = vpop.f32.mrb[20].mxu0 }
 0x6b4   :  { %v862_v3 = vadd.f32 %v1478_v1, %v861_v2  ;;  %v1619_v4 = vpop.f32.mrb[21].mxu0  ;;  %v971_v2 = vld [vmem:[%s2194_s4 + $0x1c8] sm:$0x1] }
 0x6b5   :  { %v864_v5 = vpop.f32.mrb[22].mxu0 }
 0x6b6   :  { %v865_v6 = vadd.f32 %v1478_v1, %v864_v5  ;;  %v1620_v7 = vpop.f32.mrb[23].mxu0  ;;  %v868_v8 = vmax.f32 %v862_v3, 0.0  ;;  %v972_v5 = vld [vmem:[%s2194_s4 + $0x1d0] sm:$0x1] }
 0x6b8   :  { %v869_v9 = vmax.f32 %v865_v6, 0.0 }
 0x6ba   :  { %v870_v10 = vpack.c.bf16 %v869_v9, %v868_v8 }
 0x6bc   :  { %v872_v11 = vsel %vm667_vm2, %v870_v10, 0 }
 0x6bd   :  { %1622 = vmatpush3.bf16.msra.mxu1 %v872_v11 }
 0x6be   :  { %1635 = vmatprep.subr.bf16.mxu1 %v1709_v0 }
 0x6c0   :  { %1624 = vmatmul.mubr.msk.bf16.vlgmr.msra.gmra.mrb[16].mxu1 %vm663_vm5, %v1968_v45 }
 0x6c1   :  { %1639 = vmatprep.mubr.msk.bf16.mxu1 %vm1710_vm1, %v1709_v0  ;;  %1636 = vmatpush3.bf16.msra.mxu1 %v1021_v23 }
 0x6c2   :  { %1637 = vmatprep.subr.bf16.mxu1 %v1709_v0 }
 0x6c5   :  { %1638 = vmatpush3.bf16.msra.mxu1 %v1022_v25 }
 0x6c6   :  { %1649 = vmatprep.subr.bf16.mxu1 %v1709_v0 }
 0x793   :  { %v908_v16 = vpop.f32.mrb[16].mxu1 }
 0x794   :  { %v1625_v17 = vpop.f32.mrb[17].mxu1 }
 0x795   :  { %v911_v18 = vpop.f32.mrb[18].mxu1 }
 0x796   :  { %v921_v19 = vpack.c.bf16 %v911_v18, %v908_v16  ;;  %v1626_v20 = vpop.f32.mrb[19].mxu1  ;;  %v1120_v18 = vld [vmem:[%s2194_s4 + $0x100] sm:$0xff] }
 0x798   :  { %1632 = vmatmul.mubr.msk.bf16.vlgmr.msra.gmra.mrb[24].mxu0 %vm80_vm3, %v921_v19  ;;  %v1121_v19 = vld [vmem:[%s2194_s4 + $0x108] sm:$0xff] }
 0x799   :  { %1645 = vmatprep.mubr.msk.bf16.mxu0 %vm1710_vm1, %v1709_v0  ;;  %v1124_v20 = vpack.c.bf16 %v1121_v19, %v1120_v18  ;;  %v1176_v18 = vld [vmem:[%s2194_s4 + $0x1e8] sm:$0x1] }
 0x86b   :  { %v964_v27 = vpop.f32.mrb[24].mxu0 }
 0x86c   :  { %v965_v29 = vadd.f32 %v1481_v26, %v964_v27  ;;  %v1633_v30 = vpop.f32.mrb[25].mxu0 }
 0x86d   :  { %v967_v31 = vpop.f32.mrb[26].mxu0 }
 0x86e   :  { %v983_v32 = vmul.f32 %v965_v29, %v965_v29  ;;  %v968_v33 = vadd.f32 %v1481_v26, %v967_v31  ;;  %v1634_v34 = vpop.f32.mrb[27].mxu0  ;;  %v973_v35 = vsel %vm80_vm3, %v965_v29, 0.0 }
 0x870   :  { %v974_v36 = vsel %vm326_vm6, %v968_v33, 0.0  ;;  %v984_v41 = vmul.f32 %v968_v33, %v968_v33  ;;  %v985_v39 = vsel %vm80_vm3, %v983_v32, 0.0  ;;  %v1122_v32 = vld [vmem:[%s2194_s4 + $0x110] sm:$0xff] }
 0x871   :  { %v975_v43 = vadd.f32 %v974_v36, %v973_v35 }
 0x872   :  { %v986_v44 = vsel %vm326_vm6, %v984_v41, 0.0  ;;  %vm1303_vm6 = vcmask 1043456  }
 0x873   :  { %v976_v46 = vrot.slane %v975_v43, 4  ;;  %v987_v47 = vadd.f32 %v986_v44, %v985_v39  ;;  %v1223_v44 = vld [vmem:[%s2194_s4 + $0x120] sm:$0xff] }
 0x875   :  { %v977_v48 = vadd.f32 %v976_v46, %v975_v43  ;;  %v988_v40 = vrot.slane %v987_v47, 4  ;;  %v1224_v46 = vld [vmem:[%s2194_s4 + $0x128] sm:$0xff] }
 0x877   :  { %v978_v49 = vrot.slane %v977_v48, 2  ;;  %v989_v50 = vadd.f32 %v988_v40, %v987_v47  ;;  %v1225_v47 = vpack.c.bf16 %v1224_v46, %v1223_v44 }
 0x879   :  { %v979_v52 = vadd.f32 %v978_v49, %v977_v48  ;;  %v990_v53 = vrot.slane %v989_v50, 2 }
 0x87b   :  { %v980_v55 = vrot.slane %v979_v52, 1  ;;  %v991_v56 = vadd.f32 %v990_v53, %v989_v50 }
 0x87d   :  { %v981_v54 = vadd.f32 %v980_v55, %v979_v52  ;;  %v992_v57 = vrot.slane %v991_v56, 1 }
 0x87f   :  { %v982_v58 = vmul.f32 0.083333336, %v981_v54  ;;  %v993_v59 = vadd.f32 %v992_v57, %v991_v56 }
 0x881   :  { %v994_v60 = vmul.f32 0.083333336, %v993_v59  ;;  %v995_v61 = vmul.f32 %v982_v58, %v982_v58 }
 0x883   :  { %v996_v62 = vsub.f32 %v994_v60, %v995_v61 }
 0x885   :  { %v997_v63 = vmax.f32 %v996_v62, 0.0 }
 0x887   :  { %v998_v1 = vadd.f32 1e-05, %v997_v63 }
 0x889   :  { %1705 = vrsqrt.f32 %v998_v1 }
 0x893   :  { %v1706_v3 = vpop.eup %1705 }
 0x894   :  { %v1000_v4 = vmul.f32 %v1706_v3, %v971_v2 }
 0x896   :  { %v1004_v6 = vrot.slane %v1000_v4, %v1788_v42  ;;  %v1007_v7 = vmul.f32 %v1000_v4, %v982_v58 }
 0x898   :  { %v1005_v8 = vmul.f32 %v1004_v6, %v965_v29  ;;  %v1006_v9 = vmul.f32 %v1004_v6, %v968_v33  ;;  %v1008_v10 = vsub.f32 %v972_v5, %v1007_v7  ;;  %v1123_v33 = vld [vmem:[%s2194_s4 + $0x118] sm:$0xff] }
 0x899   :  { %v1125_v34 = vpack.c.bf16 %v1123_v33, %v1122_v32  ;;  %v1488_v33 = vld [vmem:[%s2194_s4 + $0x1f8] ss:$0 sm:$0xff] }
 0x89a   :  { %v1012_v11 = vrot.slane %v1008_v10, %v1788_v42 }
 0x89c   :  { %v1013_v12 = vadd.f32 %v1012_v11, %v1005_v8  ;;  %v1014_v13 = vadd.f32 %v1012_v11, %v1006_v9 }
 0x89e   :  { %v1015_v15 = vmax.f32 %v1013_v12, 0.0  ;;  %v1016_v16 = vmax.f32 %v1014_v13, 0.0 }
 0x8a0   :  { %v1023_v17 = vpack.c.bf16 %v1016_v16, %v1015_v15 }
 0x8a2   :  { %1640 = vmatmul.mubr.msk.bf16.vlgmr.msra.gmra.mrb[20].mxu1 %vm80_vm3, %v1023_v17 }
 0x8a3   :  { %1653 = vmatprep.mubr.msk.bf16.mxu1 %vm1710_vm1, %v1709_v0  ;;  %1650 = vmatpush3.bf16.msra.mxu1 %v1124_v20 }
 0x8a4   :  { %1651 = vmatprep.subr.bf16.mxu1 %v1709_v0 }
 0x8a7   :  { %1652 = vmatpush3.bf16.msra.mxu1 %v1125_v34 }
 0x975   :  { %v1066_v22 = vpop.f32.mrb[20].mxu1 }
 0x976   :  { %v1067_v23 = vadd.f32 %v1483_v21, %v1066_v22  ;;  %v1641_v14 = vpop.f32.mrb[21].mxu1 }
 0x977   :  { %v1069_v24 = vpop.f32.mrb[22].mxu1 }
 0x978   :  { %v1070_v25 = vadd.f32 %v1483_v21, %v1069_v24  ;;  %v1642_v26 = vpop.f32.mrb[23].mxu1  ;;  %v1073_v27 = vmax.f32 %v1067_v23, 0.0  ;;  %v1177_v21 = vld [vmem:[%s2194_s4 + $0x1f0] sm:$0x1] }
 0x97a   :  { %v1074_v29 = vmax.f32 %v1070_v25, 0.0 }
 0x97c   :  { %v1075_v30 = vpack.c.bf16 %v1074_v29, %v1073_v27 }
 0x97e   :  { %v1077_v31 = vsel %vm667_vm2, %v1075_v30, 0 }
 0x97f   :  { %1644 = vmatpush3.bf16.msra.mxu0 %v1077_v31 }
 0x980   :  { %1657 = vmatprep.subr.bf16.mxu0 %v1709_v0 }
 0x982   :  { %1646 = vmatmul.mubr.msk.bf16.vlgmr.msra.gmra.mrb[28].mxu0 %vm663_vm5, %v1968_v45  ;;  %v1459_v45 = vsel %vm537_vm7, 1.0, %v1709_v0  ;;  %vm1714_vm7 = vmmov 1  }
 0x983   :  { %1659 = vmatprep.mubr.msk.bf16.mxu0 %vm1710_vm1, %v1709_v0  ;;  %1658 = vmatpush3.bf16.msra.mxu0 %v1225_v47  ;;  %vm1179_vm1 = vcmask 125952   ;;  %vm1681_vm10 = vmpackc.low %vm1303_vm6, %vm1714_vm7  ;;  %v530_v47 = vpop.permute.xlu1 %529 }
 0x984   :  { %vm540_vm11 = vcmp.eq.s32.totalorder %v530_v47, %v1899_v28 }
 0xa55   :  { %v1113_v35 = vpop.f32.mrb[28].mxu0 }
 0xa56   :  { %v1647_v36 = vpop.f32.mrb[29].mxu0 }
 0xa57   :  { %v1116_v41 = vpop.f32.mrb[30].mxu0 }
 0xa58   :  { %v1126_v43 = vpack.c.bf16 %v1116_v41, %v1113_v35  ;;  %v1648_v39 = vpop.f32.mrb[31].mxu0 }
 0xa5a   :  { %1654 = vmatmul.mubr.msk.bf16.vlgmr.msra.gmra.mrb[24].mxu1 %vm80_vm3, %v1126_v43 }
 0xa5b   :  { %1667 = vmatprep.mubr.msk.f32.mxu1 %vm663_vm5, %v1459_v45 }
 0xb2d   :  { %v1169_v48 = vpop.f32.mrb[24].mxu1 }
 0xb2e   :  { %v1170_v40 = vadd.f32 %v1486_v37, %v1169_v48  ;;  %v1655_v49 = vpop.f32.mrb[25].mxu1 }
 0xb2f   :  { %v1172_v50 = vpop.f32.mrb[26].mxu1  ;;  %v1460_v49 = vsel %vm538_vm8, 1.0, %v1709_v0 }
 0xb30   :  { %v1189_v52 = vmul.f32 %v1170_v40, %v1170_v40  ;;  %v1173_v53 = vadd.f32 %v1486_v37, %v1172_v50  ;;  %v1656_v55 = vpop.f32.mrb[27].mxu1  ;;  %v1178_v56 = vsel %vm721_vm9, %v1170_v40, 0.0 }
 0xb31   :  { %v1462_v55 = vsel %vm540_vm11, 1.0, %v1709_v0 }
 0xb32   :  { %v1180_v54 = vsel %vm1179_vm1, %v1173_v53, 0.0  ;;  %v1190_v57 = vmul.f32 %v1173_v53, %v1173_v53  ;;  %v1191_v59 = vsel %vm721_vm9, %v1189_v52, 0.0  ;;  %v536_v52 = vpop.permute.xlu1 %535 }
 0xb33   :  { %v1181_v58 = vadd.f32 %v1180_v54, %v1178_v56  ;;  %vm542_vm13 = vcmp.eq.s32.totalorder %v536_v52, %v1899_v28 }
 0xb34   :  { %v1192_v60 = vsel %vm1179_vm1, %v1190_v57, 0.0  ;;  %v1464_v57 = vsel %vm542_vm13, 1.0, %v1709_v0 }
 0xb35   :  { %v1182_v61 = vrot.slane %v1181_v58, 4  ;;  %v1193_v62 = vadd.f32 %v1192_v60, %v1191_v59 }
 0xb37   :  { %v1183_v63 = vadd.f32 %v1182_v61, %v1181_v58  ;;  %v1194_v1 = vrot.slane %v1193_v62, 4 }
 0xb39   :  { %v1184_v2 = vrot.slane %v1183_v63, 2  ;;  %v1195_v3 = vadd.f32 %v1194_v1, %v1193_v62 }
 0xb3b   :  { %v1185_v4 = vadd.f32 %v1184_v2, %v1183_v63  ;;  %v1196_v5 = vrot.slane %v1195_v3, 2 }
 0xb3d   :  { %v1186_v6 = vrot.slane %v1185_v4, 1  ;;  %v1197_v7 = vadd.f32 %v1196_v5, %v1195_v3 }
 0xb3f   :  { %v1187_v8 = vadd.f32 %v1186_v6, %v1185_v4  ;;  %v1198_v9 = vrot.slane %v1197_v7, 1 }
 0xb41   :  { %v1188_v10 = vmul.f32 0.083333336, %v1187_v8  ;;  %v1199_v11 = vadd.f32 %v1198_v9, %v1197_v7 }
 0xb43   :  { %v1200_v12 = vmul.f32 0.083333336, %v1199_v11  ;;  %v1201_v13 = vmul.f32 %v1188_v10, %v1188_v10 }
 0xb45   :  { %v1202_v15 = vsub.f32 %v1200_v12, %v1201_v13 }
 0xb47   :  { %v1203_v16 = vmax.f32 %v1202_v15, 0.0 }
 0xb49   :  { %v1204_v17 = vadd.f32 1e-05, %v1203_v16 }
 0xb4b   :  { %1707 = vrsqrt.f32 %v1204_v17 }
 0xb55   :  { %v1708_v19 = vpop.eup %1707 }
 0xb56   :  { %v1206_v20 = vmul.f32 %v1708_v19, %v1176_v18 }
 0xb58   :  { %v1210_v22 = vrot.slane %v1206_v20, %v1788_v42  ;;  %v1213_v23 = vmul.f32 %v1206_v20, %v1188_v10 }
 0xb5a   :  { %v1211_v14 = vmul.f32 %v1210_v22, %v1170_v40  ;;  %v1212_v24 = vmul.f32 %v1210_v22, %v1173_v53  ;;  %v1214_v25 = vsub.f32 %v1177_v21, %v1213_v23  ;;  %v533_v40 = vpop.permute.xlu0 %532 }
 0xb5b   :  { %vm541_vm12 = vcmp.eq.s32.totalorder %v533_v40, %v1899_v28 }
 0xb5c   :  { %v1218_v26 = vrot.slane %v1214_v25, %v1788_v42  ;;  %v1463_v54 = vsel %vm541_vm12, 1.0, %v1709_v0 }
 0xb5e   :  { %v1219_v27 = vadd.f32 %v1218_v26, %v1211_v14  ;;  %v1220_v29 = vadd.f32 %v1218_v26, %v1212_v24 }
 0xb60   :  { %v1221_v30 = vmax.f32 %v1219_v27, 0.0  ;;  %v1222_v31 = vmax.f32 %v1220_v29, 0.0 }
 0xb62   :  { %v1226_v32 = vpack.c.bf16 %v1222_v31, %v1221_v30 }
 0xb64   :  { %1660 = vmatmul.mubr.msk.bf16.vlgmr.msra.gmra.mrb[32].mxu0 %vm721_vm9, %v1226_v32 }
 0xc37   :  { %v1269_v34 = vpop.f32.mrb[32].mxu0 }
 0xc38   :  { %v1270_v35 = vadd.f32 %v1488_v33, %v1269_v34  ;;  %v1661_v36 = vpop.f32.mrb[33].mxu0 }
 0xc39   :  { %v1272_v41 = vpop.f32.mrb[34].mxu0 }
 0xc3a   :  { %v1282_v43 = vsel %vm721_vm9, %v1270_v35, 0.0  ;;  %v1273_v39 = vadd.f32 %v1488_v33, %v1272_v41  ;;  %v1662_v42 = vpop.f32.mrb[35].mxu0 }
 0xc3b   :  { %1284 = vst [vmem:[%s2199_s5] sm:$0xff] %v1282_v43 }
 0xc3c   :  { %v1283_v45 = vsel %vm721_vm9, %v1273_v39, 0.0  ;;  %v1680_v44 = vpack.c.bf16 %v1273_v39, %v1270_v35  ;;  %v1431_v46 = vsel %vm1179_vm1, %v1273_v39, 0.0 }
 0xc3d   :  { %1285 = vst [vmem:[%s2199_s5 + $0x8] sm:$0xf] %v1283_v45  ;;  %v1432_v37 = vadd.f32 %v1431_v46, %v1282_v43 }
 0xc3e   :  { %1682 = vmatprep.subr.msk.bf16.mxu1 %vm1681_vm10, %v1680_v44 }
 0xc3f   :  { %v1433_v48 = vrot.slane %v1432_v37, 4  ;;  %1685 = vmatpush3.bf16.msk.msra.mxu1 %vm1681_vm10, %v1680_v44 }
 0xc41   :  { %v1434_v50 = vadd.f32 %v1433_v48, %v1432_v37 }
 0xc42   :  { %1668 = vmatmul.mubr.msk.f32.vlgmr.msra.gmra.mrb[28].mxu1 %vm663_vm5, %v1460_v49 }
 0xc43   :  { %v1435_v53 = vrot.slane %v1434_v50, 2  ;;  %1670 = vmatprep.mubr.msk.f32.mxu1 %vm663_vm5, %v1935_v51 }
 0xc45   :  { %v1436_v56 = vadd.f32 %v1435_v53, %v1434_v50 }
 0xc46   :  { %1671 = vmatmul.mubr.msk.f32.gmra.mrb[30].mxu1 %vm663_vm5, %v1462_v55 }
 0xc47   :  { %v1437_v38 = vrot.slane %v1436_v56, 1  ;;  %1673 = vmatprep.mubr.msk.f32.mxu1 %vm663_vm5, %v1463_v54 }
 0xc49   :  { %v1438_v58 = vadd.f32 %v1437_v38, %v1436_v56 }
 0xc4a   :  { %1674 = vmatmul.mubr.msk.f32.gmra.mrb[32].mxu1 %vm663_vm5, %v1464_v57 }
 0xc4b   :  { %v1440_v59 = vmul.f32 0.083333336, %v1438_v58 }
 0xc4d   :  { %v1441_v51 = vsel %vm721_vm9, %v1440_v59, 0.0 }
 0xc4e   :  { %1442 = vst [vmem:[%s2199_s5 + $0x28] sm:$0x1] %v1441_v51 }
 0xd15   :  { %v1669_v60 = vpop.f32.mrb[28].mxu1 }
 0xd16   :  { %v1373_v61 = vpop.f32.mrb[29].mxu1 }
 0xd19   :  { %v1672_v28 = vpop.f32.mrb[30].mxu1 }
 0xd1a   :  { %v1407_v62 = vrot.slane %v1672_v28, 7  ;;  %v1383_v63 = vpop.f32.mrb[31].mxu1 }
 0xd1b   :  { %v1406_v1 = vrot.slane %v1383_v63, 7 }
 0xd1d   :  { %v1675_v2 = vpop.f32.mrb[32].mxu1  ;;  %v1408_v3 = vsel %vm278_vm4, %v1406_v1, %v1407_v62 }
 0xd1e   :  { %v1411_v0 = vrot.slane %v1675_v2, 7  ;;  %1413 = vrot.lane.b32.xlu0 %v1408_v3, %s1715_s7  ;;  %v1393_v4 = vpop.f32.mrb[33].mxu1 }
 0xd1f   :  { %v1409_v5 = vrot.slane %v1393_v4, 7 }
 0xd21   :  { %v1412_v6 = vsel %vm278_vm4, %v1409_v5, %v1411_v0  ;;  %v1410_v7 = vsel %vm278_vm4, %v1407_v62, %v1409_v5 }
 0xd22   :  { %1417 = vrot.lane.b32.xlu0 %v1412_v6, %s1715_s7  ;;  %1415 = vrot.lane.b32.xlu1 %v1410_v7, %s1715_s7 }
 0xd90   :  { %v1414_v8 = vpop.permute.xlu0 %1413 }
 0xd91   :  { %v1422_v9 = vsel %vm721_vm9, %v1373_v61, %v1414_v8 }
 0xd92   :  { %v1425_v10 = vsel %vm80_vm3, %v1422_v9, 0.0 }
 0xd93   :  { %1428 = vst [vmem:[%s2199_s5 + $0x10] sm:$0xff] %v1425_v10 }
 0xd94   :  { %v1418_v11 = vpop.permute.xlu0 %1417  ;;  %v1416_v12 = vpop.permute.xlu1 %1415 }
 0xd95   :  { %v1424_v13 = vsel %vm721_vm9, %v1383_v63, %v1418_v11  ;;  %v1423_v15 = vsel %vm721_vm9, %v1669_v60, %v1416_v12 }
 0xd96   :  { %v1427_v16 = vsel %vm80_vm3, %v1424_v13, 0.0  ;;  %v1426_v17 = vsel %vm80_vm3, %v1423_v15, 0.0 }
 0xd97   :  { %1430 = vst [vmem:[%s2199_s5 + $0x20] sm:$0x7f] %v1427_v16  ;;  %1429 = vst [vmem:[%s2199_s5 + $0x18] sm:$0xff] %v1426_v17 }

</bundles_post_ra>
